<compile_context>
chip_gen: v6e
topology: v6e:2x2x1
jax: 0.10.0
libtpu: 0.0.40
codegen_flags: <defaults>
</compile_context>

<pallas_src>
import numpy as np
import jax
import jax.numpy as jnp
from jax.experimental import pallas as pl
from jax.experimental.pallas import tpu as pltpu

NEG_SLOPE = 0.2
BN_EPS = 1e-5


def _make_cond_disc_kernel(hwc1, n_total, neg_slope=NEG_SLOPE, eps=BN_EPS):
    """Two-phase (stats / normalize+reduce) batch-tiled kernel body."""
    inv_n = 1.0 / float(n_total)

    def kernel(xin_ref, wfull_ref, fold_ref, unfold_ref, gb_ref, w2b_ref,
               o_ref, stats_ref):
        ph = pl.program_id(0)      # 0: accumulate BN stats, 1: normalize + conv2
        bt = pl.program_id(1)      # batch tile index

        # conv1 (+ bias + folded conditioning): one lane-dense MXU matmul, f32 acc.
        # Recomputed in phase 1 -- cheaper than streaming z (TB x HW*C1 f32) to HBM
        # and back; the only re-streamed operand is the thin xin tile.
        z = jnp.dot(xin_ref[...], wfull_ref[...],
                    preferred_element_type=jnp.float32)            # (TB, HW*C1)

        @pl.when(jnp.logical_and(ph == 0, bt == 0))
        def _init_stats():
            stats_ref[...] = jnp.zeros_like(stats_ref)

        @pl.when(ph == 0)
        def _accumulate_stats():
            # Per-lane (position*channel) sums folded to per-channel sums on the MXU.
            colsum = jnp.sum(z, axis=0, keepdims=True)             # (1, HW*C1)
            colsq = jnp.sum(z * z, axis=0, keepdims=True)
            chsum = jnp.dot(colsum, fold_ref[...],
                            preferred_element_type=jnp.float32)    # (1, C1)
            chsq = jnp.dot(colsq, fold_ref[...],
                           preferred_element_type=jnp.float32)
            stats_ref[...] = stats_ref[...] + jnp.concatenate([chsum, chsq], axis=0)
            o_ref[...] = jnp.zeros_like(o_ref)   # placeholder; overwritten in phase 1

        @pl.when(ph == 1)
        def _normalize_and_reduce():
            st = stats_ref[...]                                    # (2, C1)
            gbv = gb_ref[...]                                      # (2, C1)
            mean = st[0:1, :] * inv_n
            var = st[1:2, :] * inv_n - mean * mean                 # biased train-mode var
            scale = gbv[0:1, :] * jax.lax.rsqrt(var + eps)
            shift = gbv[1:2, :] - mean * scale
            # Broadcast per-channel scale/shift back to the per-lane layout (MXU).
            scale_l = jnp.dot(scale, unfold_ref[...],
                              preferred_element_type=jnp.float32)  # (1, HW*C1)
            shift_l = jnp.dot(shift, unfold_ref[...],
                              preferred_element_type=jnp.float32)
            h = z * scale_l + shift_l                              # BatchNorm affine
            h = jnp.maximum(h, neg_slope * h)                      # LeakyReLU(0.2)
            # conv2 (k=4, s=4, p=0 on the 4x4 map == full contraction) + bias.
            out = jnp.dot(h, w2b_ref[0:hwc1, :],
                          preferred_element_type=jnp.float32)      # (TB, F)
            o_ref[...] = (out + w2b_ref[hwc1:hwc1 + 1, :]).astype(o_ref.dtype)

    return kernel


def _pick_batch_tile(B, max_tile=1024):
    if B <= max_tile or B % 8 != 0:
        return B
    tb = max_tile
    while B % tb != 0:
        tb -= 8
    return tb


def cond_discriminator_forward(x, c, params, *, mxu_dtype=jnp.float32, batch_tile=None):
    """x: [B, in_chans*8, H, W] (NCHW); c: [B, cond_dim]. Returns [B, out_chans, 1, 1]."""
    w1, b1, gamma, beta, w2, b2 = params
    B, Cx, H, W = x.shape
    cond_dim = c.shape[-1]
    C1 = w1.shape[0]
    assert w1.shape[1] == Cx + cond_dim
    F = w2.shape[0]
    assert (w2.shape[2], w2.shape[3]) == (H, W), \
        "conv2 (k=4, s=4, p=0) must contract the full HxW map"
    HW = H * W
    HWC1 = HW * C1
    Kin = HW * Cx + cond_dim + 1

    if batch_tile is None:
        batch_tile = _pick_batch_tile(B)
    TB = batch_tile
    assert B % TB == 0 and (TB == B or TB % 8 == 0)
    nbt = B // TB

    f32 = jnp.float32

    # ---- static (trace-time) 3x3 / pad=1 neighbourhood structure ----
    S = np.zeros((HW, HW, 3, 3), np.float32)           # S[p_in, p_out, kh, kw]
    for p_out in range(HW):
        ho, wo = divmod(p_out, W)
        for kh in range(3):
            for kw in range(3):
                hi, wi = ho + kh - 1, wo + kw - 1
                if 0 <= hi < H and 0 <= wi < W:
                    S[hi * W + wi, p_out, kh, kw] = 1.0
    valid = S.sum(axis=0)                              # (HW, 3, 3) in-bounds indicator

    # ---- parameter prep (hoisted/cached per model in a real deployment) ----
    w1f = w1.astype(f32)
    # conv1 as a dense (HW*Cx + cond + 1, HW*C1) matrix: x part, cond part, b1 row.
    W_x = jnp.einsum('PQkl,oikl->PiQo', jnp.asarray(S), w1f[:, :Cx]).reshape(HW * Cx, HWC1)
    W_c = jnp.einsum('Qkl,ojkl->jQo', jnp.asarray(valid), w1f[:, Cx:]).reshape(cond_dim, HWC1)
    W_b = jnp.tile(b1.astype(f32), HW).reshape(1, HWC1)
    W_full = jnp.concatenate([W_x, W_c, W_b], axis=0).astype(mxu_dtype)    # (Kin, HW*C1)

    fold_np = np.tile(np.eye(C1, dtype=np.float32), (HW, 1))               # (HW*C1, C1)
    fold = jnp.asarray(fold_np)
    unfold = jnp.asarray(np.ascontiguousarray(fold_np.T))                  # (C1, HW*C1)

    gb = jnp.stack([gamma, beta]).astype(f32)                              # (2, C1)
    w2mat = w2.astype(f32).transpose(2, 3, 1, 0).reshape(HWC1, F)          # row p*C1+o
    w2b = jnp.concatenate([w2mat, b2.reshape(1, F).astype(f32)], axis=0)   # (HW*C1+1, F)

    # ---- activation: row b = [x[b] (p-major, chan-minor), c[b], 1.0] ----
    x_flat = x.astype(f32).transpose(0, 2, 3, 1).reshape(B, HW * Cx)
    xin = jnp.concatenate([x_flat, c.astype(f32), jnp.ones((B, 1), f32)],
                          axis=1).astype(mxu_dtype)                        # (B, Kin)

    kernel = _make_cond_disc_kernel(HWC1, B * HW)
    out = pl.pallas_call(
        kernel,
        out_shape=jax.ShapeDtypeStruct((B, F), jnp.float32),
        grid_spec=pltpu.PrefetchScalarGridSpec(
            num_scalar_prefetch=0,
            grid=(2, nbt),                                   # (phase, batch tile)
            in_specs=[
                pl.BlockSpec((TB, Kin), lambda ph, bt: (bt, 0)),      # xin (re-streamed)
                pl.BlockSpec((Kin, HWC1), lambda ph, bt: (0, 0)),     # W_full (resident)
                pl.BlockSpec((HWC1, C1), lambda ph, bt: (0, 0)),      # fold
                pl.BlockSpec((C1, HWC1), lambda ph, bt: (0, 0)),      # unfold
                pl.BlockSpec((2, C1), lambda ph, bt: (0, 0)),         # gamma/beta
                pl.BlockSpec((HWC1 + 1, F), lambda ph, bt: (0, 0)),   # w2 | b2
            ],
            out_specs=pl.BlockSpec((TB, F), lambda ph, bt: (bt, 0)),
            scratch_shapes=[pltpu.VMEM((2, C1), jnp.float32)],        # BN sum / sumsq
        ),
        compiler_params=pltpu.CompilerParams(
            dimension_semantics=("arbitrary", "arbitrary")),
    )(xin, W_full, fold, unfold, gb, w2b)

    return out.reshape(B, F, 1, 1)


def reference_forward(x, c, params):
    """Pure-JAX reference (same math as the torch module) for the correctness check."""
    w1, b1, gamma, beta, w2, b2 = params
    B, Cx, H, W = x.shape
    cond_dim = c.shape[-1]
    c_map = jnp.broadcast_to(c.reshape(B, cond_dim, 1, 1), (B, cond_dim, H, W))
    xc = jnp.concatenate([x, c_map], axis=1)
    z = jax.lax.conv_general_dilated(xc, w1, (1, 1), ((1, 1), (1, 1)),
                                     dimension_numbers=('NCHW', 'OIHW', 'NCHW'))
    z = z + b1.reshape(1, -1, 1, 1)
    mean = jnp.mean(z, axis=(0, 2, 3), keepdims=True)
    var = jnp.mean((z - mean) ** 2, axis=(0, 2, 3), keepdims=True)
    h = (z - mean) / jnp.sqrt(var + BN_EPS)
    h = h * gamma.reshape(1, -1, 1, 1) + beta.reshape(1, -1, 1, 1)
    h = jnp.where(h > 0, h, NEG_SLOPE * h)
    out = jax.lax.conv_general_dilated(h, w2, (4, 4), ((0, 0), (0, 0)),
                                       dimension_numbers=('NCHW', 'OIHW', 'NCHW'))
    return out + b2.reshape(1, -1, 1, 1)


if __name__ == "__main__":
    in_chans, cond_dim, out_chans = 4, 16, 1
    H, W = 4, 4
    Cx = in_chans * 8            # 32 (x channel count, per "8Nd" docstring)
    Cin = Cx + cond_dim          # 48
    C1 = in_chans * 8            # 32 (first CBR2d output channels)

    key = jax.random.PRNGKey(0)
    k1, k2, k3, k4, k5, k6, kx, kc, kx2, kc2 = jax.random.split(key, 10)

    # Deterministic synthetic parameters (shapes from the module __init__).
    w1 = 0.05 * jax.random.normal(k1, (C1, Cin, 3, 3), jnp.float32)
    b1 = 0.05 * jax.random.normal(k2, (C1,), jnp.float32)
    gamma = 1.0 + 0.1 * jax.random.normal(k3, (C1,), jnp.float32)
    beta = 0.1 * jax.random.normal(k4, (C1,), jnp.float32)
    w2 = 0.05 * jax.random.normal(k5, (out_chans, C1, 4, 4), jnp.float32)
    b2 = 0.05 * jax.random.normal(k6, (out_chans,), jnp.float32)
    params = (w1, b1, gamma, beta, w2, b2)

    # --- check 1: module-spec size (B=2), single batch tile ---
    x = jax.random.normal(kx, (2, Cx, H, W), jnp.float32)
    c = jax.random.normal(kc, (2, cond_dim), jnp.float32)
    out = jax.block_until_ready(cond_discriminator_forward(x, c, params))
    ref = reference_forward(x, c, params)
    assert out.shape == (2, out_chans, 1, 1)
    assert jnp.allclose(out, ref, rtol=1e-3, atol=1e-3), (out, ref)

    # --- check 2: batch-tiled grid (2 tiles of 8 images, two-phase BN across tiles) ---
    xb = jax.random.normal(kx2, (16, Cx, H, W), jnp.float32)
    cb = jax.random.normal(kc2, (16, cond_dim), jnp.float32)
    outb = jax.block_until_ready(
        cond_discriminator_forward(xb, cb, params, batch_tile=8))
    refb = reference_forward(xb, cb, params)
    assert outb.shape == (16, out_chans, 1, 1)
    assert jnp.allclose(outb, refb, rtol=1e-3, atol=1e-3), (outb, refb)

    print("KERNEL_OK")
</pallas_src>

<mosaic_0001>
module attributes {stable_mosaic.version = 11 : i64} {
  func.func @kernel(%arg0: i32, %arg1: i32, %arg2: memref<2x529xf32, #tpu.memory_space<vmem>>, %arg3: memref<529x512xf32, #tpu.memory_space<vmem>>, %arg4: memref<512x32xf32, #tpu.memory_space<vmem>>, %arg5: memref<32x512xf32, #tpu.memory_space<vmem>>, %arg6: memref<2x32xf32, #tpu.memory_space<vmem>>, %arg7: memref<513x1xf32, #tpu.memory_space<vmem>>, %arg8: memref<2x1xf32, #tpu.memory_space<vmem>>, %arg9: memref<2x32xf32, #tpu.memory_space<vmem>>) attributes {dimension_semantics = [#tpu.dimension_semantics<arbitrary>, #tpu.dimension_semantics<arbitrary>], iteration_bounds = array<i64: 2, 1>, scalar_prefetch = 0 : i64, scratch_operands = 1 : i64, tpu.core_type = #tpu.core_type<tc>, window_params = [{transform_indices = @transform_0, window_bounds = array<i64: 2, 529>}, {pipeline_mode = #tpu.pipeline_mode<synchronous>, transform_indices = @transform_1, window_bounds = array<i64: 529, 512>}, {pipeline_mode = #tpu.pipeline_mode<synchronous>, transform_indices = @transform_2, window_bounds = array<i64: 512, 32>}, {pipeline_mode = #tpu.pipeline_mode<synchronous>, transform_indices = @transform_3, window_bounds = array<i64: 32, 512>}, {pipeline_mode = #tpu.pipeline_mode<synchronous>, transform_indices = @transform_4, window_bounds = array<i64: 2, 32>}, {pipeline_mode = #tpu.pipeline_mode<synchronous>, transform_indices = @transform_5, window_bounds = array<i64: 513, 1>}, {transform_indices = @transform_6, window_bounds = array<i64: 2, 1>}]} {
    %c0 = arith.constant 0 : index
    %c0_0 = arith.constant 0 : index
    %0 = vector.load %arg2[%c0, %c0_0] : memref<2x529xf32, #tpu.memory_space<vmem>>, vector<2x529xf32>
    %c0_1 = arith.constant 0 : index
    %c0_2 = arith.constant 0 : index
    %1 = vector.load %arg3[%c0_1, %c0_2] : memref<529x512xf32, #tpu.memory_space<vmem>>, vector<529x512xf32>
    %cst = arith.constant dense<0.000000e+00> : vector<2x512xf32>
    %2 = tpu.matmul %0, %1, %cst {dimension_numbers = #tpu.dot_dimension_numbers<[1], [0], [0], [1], [0, 0, 1, 1], [], []>} : vector<2x529xf32>, vector<529x512xf32>, vector<2x512xf32> -> vector<2x512xf32>
    %c0_i32 = arith.constant 0 : i32
    %3 = arith.cmpi eq, %arg0, %c0_i32 : i32
    %c0_i32_3 = arith.constant 0 : i32
    %4 = arith.cmpi eq, %arg1, %c0_i32_3 : i32
    %5 = arith.andi %3, %4 : i1
    %6 = arith.extui %5 : i1 to i32
    %c0_i32_4 = arith.constant 0 : i32
    %7 = arith.cmpi ne, %6, %c0_i32_4 : i32
    scf.if %7 {
      %cst_8 = arith.constant 0.000000e+00 : f32
      %14 = vector.broadcast %cst_8 : f32 to vector<2x32xf32>
      %c0_9 = arith.constant 0 : index
      %c0_10 = arith.constant 0 : index
      %15 = vector.load %arg9[%c0_9, %c0_10] : memref<2x32xf32, #tpu.memory_space<vmem>>, vector<2x32xf32>
      tpu.vector_store %arg9[%c0_9, %c0_10], %14 {strides = array<i32>} : memref<2x32xf32, #tpu.memory_space<vmem>>, vector<2x32xf32>,
    } else {
    }
    %c0_i32_5 = arith.constant 0 : i32
    %8 = arith.cmpi eq, %arg0, %c0_i32_5 : i32
    %9 = arith.extui %8 : i1 to i32
    %c0_i32_6 = arith.constant 0 : i32
    %10 = arith.cmpi ne, %9, %c0_i32_6 : i32
    scf.if %10 {
      %cst_8 = arith.constant dense<0.000000e+00> : vector<512xf32>
      %14 = vector.multi_reduction <add>, %2, %cst_8 [0] : vector<2x512xf32> to vector<512xf32>
      %15 = vector.shape_cast %14 : vector<512xf32> to vector<1x512xf32>
      %16 = arith.mulf %2, %2 : vector<2x512xf32>
      %cst_9 = arith.constant dense<0.000000e+00> : vector<512xf32>
      %17 = vector.multi_reduction <add>, %16, %cst_9 [0] : vector<2x512xf32> to vector<512xf32>
      %18 = vector.shape_cast %17 : vector<512xf32> to vector<1x512xf32>
      %c0_10 = arith.constant 0 : index
      %c0_11 = arith.constant 0 : index
      %19 = vector.load %arg4[%c0_10, %c0_11] : memref<512x32xf32, #tpu.memory_space<vmem>>, vector<512x32xf32>
      %cst_12 = arith.constant dense<0.000000e+00> : vector<1x32xf32>
      %20 = tpu.matmul %15, %19, %cst_12 {dimension_numbers = #tpu.dot_dimension_numbers<[1], [0], [0], [1], [0, 0, 1, 1], [], []>} : vector<1x512xf32>, vector<512x32xf32>, vector<1x32xf32> -> vector<1x32xf32>
      %c0_13 = arith.constant 0 : index
      %c0_14 = arith.constant 0 : index
      %21 = vector.load %arg4[%c0_13, %c0_14] : memref<512x32xf32, #tpu.memory_space<vmem>>, vector<512x32xf32>
      %cst_15 = arith.constant dense<0.000000e+00> : vector<1x32xf32>
      %22 = tpu.matmul %18, %21, %cst_15 {dimension_numbers = #tpu.dot_dimension_numbers<[1], [0], [0], [1], [0, 0, 1, 1], [], []>} : vector<1x512xf32>, vector<512x32xf32>, vector<1x32xf32> -> vector<1x32xf32>
      %c0_16 = arith.constant 0 : index
      %c0_17 = arith.constant 0 : index
      %23 = vector.load %arg9[%c0_16, %c0_17] : memref<2x32xf32, #tpu.memory_space<vmem>>, vector<2x32xf32>
      %24 = tpu.concatenate %20, %22 in 0 : vector<1x32xf32>, vector<1x32xf32> -> vector<2x32xf32>
      %25 = arith.addf %23, %24 : vector<2x32xf32>
      %c0_18 = arith.constant 0 : index
      %c0_19 = arith.constant 0 : index
      %26 = vector.load %arg9[%c0_18, %c0_19] : memref<2x32xf32, #tpu.memory_space<vmem>>, vector<2x32xf32>
      tpu.vector_store %arg9[%c0_18, %c0_19], %25 {strides = array<i32>} : memref<2x32xf32, #tpu.memory_space<vmem>>, vector<2x32xf32>,
      %cst_20 = arith.constant 0.000000e+00 : f32
      %27 = vector.broadcast %cst_20 : f32 to vector<2x1xf32>
      %c0_21 = arith.constant 0 : index
      %c0_22 = arith.constant 0 : index
      %28 = vector.load %arg8[%c0_21, %c0_22] : memref<2x1xf32, #tpu.memory_space<vmem>>, vector<2x1xf32>
      tpu.vector_store %arg8[%c0_21, %c0_22], %27 {strides = array<i32>} : memref<2x1xf32, #tpu.memory_space<vmem>>, vector<2x1xf32>,
    } else {
    }
    %c1_i32 = arith.constant 1 : i32
    %11 = arith.cmpi eq, %arg0, %c1_i32 : i32
    %12 = arith.extui %11 : i1 to i32
    %c0_i32_7 = arith.constant 0 : i32
    %13 = arith.cmpi ne, %12, %c0_i32_7 : i32
    scf.if %13 {
      %c0_8 = arith.constant 0 : index
      %c0_9 = arith.constant 0 : index
      %14 = vector.load %arg9[%c0_8, %c0_9] : memref<2x32xf32, #tpu.memory_space<vmem>>, vector<2x32xf32>
      %c0_10 = arith.constant 0 : index
      %c0_11 = arith.constant 0 : index
      %15 = vector.load %arg6[%c0_10, %c0_11] : memref<2x32xf32, #tpu.memory_space<vmem>>, vector<2x32xf32>
      %16 = vector.extract_strided_slice %14 {offsets = [0, 0], sizes = [1, 32], strides = [1, 1]} : vector<2x32xf32> to vector<1x32xf32>
      %cst_12 = arith.constant 3.125000e-02 : f32
      %17 = vector.broadcast %cst_12 : f32 to vector<1x32xf32>
      %18 = arith.mulf %16, %17 : vector<1x32xf32>
      %19 = vector.extract_strided_slice %14 {offsets = [1, 0], sizes = [1, 32], strides = [1, 1]} : vector<2x32xf32> to vector<1x32xf32>
      %cst_13 = arith.constant 3.125000e-02 : f32
      %20 = vector.broadcast %cst_13 : f32 to vector<1x32xf32>
      %21 = arith.mulf %19, %20 : vector<1x32xf32>
      %22 = arith.mulf %18, %18 : vector<1x32xf32>
      %23 = arith.subf %21, %22 : vector<1x32xf32>
      %24 = vector.extract_strided_slice %15 {offsets = [0, 0], sizes = [1, 32], strides = [1, 1]} : vector<2x32xf32> to vector<1x32xf32>
      %cst_14 = arith.constant 9.99999974E-6 : f32
      %25 = vector.broadcast %cst_14 : f32 to vector<1x32xf32>
      %26 = arith.addf %23, %25 : vector<1x32xf32>
      %27 = math.rsqrt %26 : vector<1x32xf32>
      %28 = arith.mulf %24, %27 : vector<1x32xf32>
      %29 = vector.extract_strided_slice %15 {offsets = [1, 0], sizes = [1, 32], strides = [1, 1]} : vector<2x32xf32> to vector<1x32xf32>
      %30 = arith.mulf %18, %28 : vector<1x32xf32>
      %31 = arith.subf %29, %30 : vector<1x32xf32>
      %c0_15 = arith.constant 0 : index
      %c0_16 = arith.constant 0 : index
      %32 = vector.load %arg5[%c0_15, %c0_16] : memref<32x512xf32, #tpu.memory_space<vmem>>, vector<32x512xf32>
      %cst_17 = arith.constant dense<0.000000e+00> : vector<1x512xf32>
      %33 = tpu.matmul %28, %32, %cst_17 {dimension_numbers = #tpu.dot_dimension_numbers<[1], [0], [0], [1], [0, 0, 1, 1], [], []>} : vector<1x32xf32>, vector<32x512xf32>, vector<1x512xf32> -> vector<1x512xf32>
      %c0_18 = arith.constant 0 : index
      %c0_19 = arith.constant 0 : index
      %34 = vector.load %arg5[%c0_18, %c0_19] : memref<32x512xf32, #tpu.memory_space<vmem>>, vector<32x512xf32>
      %cst_20 = arith.constant dense<0.000000e+00> : vector<1x512xf32>
      %35 = tpu.matmul %31, %34, %cst_20 {dimension_numbers = #tpu.dot_dimension_numbers<[1], [0], [0], [1], [0, 0, 1, 1], [], []>} : vector<1x32xf32>, vector<32x512xf32>, vector<1x512xf32> -> vector<1x512xf32>
      %36 = vector.broadcast %33 : vector<1x512xf32> to vector<2x512xf32>
      %37 = arith.mulf %2, %36 : vector<2x512xf32>
      %38 = vector.broadcast %35 : vector<1x512xf32> to vector<2x512xf32>
      %39 = arith.addf %37, %38 : vector<2x512xf32>
      %cst_21 = arith.constant 2.000000e-01 : f32
      %40 = vector.broadcast %cst_21 : f32 to vector<2x512xf32>
      %41 = arith.mulf %40, %39 : vector<2x512xf32>
      %42 = arith.maximumf %39, %41 : vector<2x512xf32>
      %c0_22 = arith.constant 0 : index
      %c0_23 = arith.constant 0 : index
      %43 = vector.load %arg7[%c0_22, %c0_23] : memref<513x1xf32, #tpu.memory_space<vmem>>, vector<512x1xf32>
      %cst_24 = arith.constant dense<0.000000e+00> : vector<2x1xf32>
      %44 = tpu.matmul %42, %43, %cst_24 {dimension_numbers = #tpu.dot_dimension_numbers<[1], [0], [0], [1], [0, 0, 1, 1], [], []>} : vector<2x512xf32>, vector<512x1xf32>, vector<2x1xf32> -> vector<2x1xf32>
      %c512 = arith.constant 512 : index
      %c0_25 = arith.constant 0 : index
      %45 = vector.load %arg7[%c512, %c0_25] : memref<513x1xf32, #tpu.memory_space<vmem>>, vector<1x1xf32>
      %46 = vector.broadcast %45 : vector<1x1xf32> to vector<2x1xf32>
      %47 = arith.addf %44, %46 : vector<2x1xf32>
      %c0_26 = arith.constant 0 : index
      %c0_27 = arith.constant 0 : index
      %48 = vector.load %arg8[%c0_26, %c0_27] : memref<2x1xf32, #tpu.memory_space<vmem>>, vector<2x1xf32>
      tpu.vector_store %arg8[%c0_26, %c0_27], %47 {strides = array<i32>} : memref<2x1xf32, #tpu.memory_space<vmem>>, vector<2x1xf32>,
    } else {
    }
    return
  }
  func.func @transform_0(%arg0: i32, %arg1: i32) -> (i32, i32) {
    %c0_i32 = arith.constant 0 : i32
    %c0_i32_0 = arith.constant 0 : i32
    return %arg1, %c0_i32 : i32, i32
  }
  func.func @transform_1(%arg0: i32, %arg1: i32) -> (i32, i32) {
    %c0_i32 = arith.constant 0 : i32
    %c0_i32_0 = arith.constant 0 : i32
    %c0_i32_1 = arith.constant 0 : i32
    return %c0_i32, %c0_i32_0 : i32, i32
  }
  func.func @transform_2(%arg0: i32, %arg1: i32) -> (i32, i32) {
    %c0_i32 = arith.constant 0 : i32
    %c0_i32_0 = arith.constant 0 : i32
    %c0_i32_1 = arith.constant 0 : i32
    return %c0_i32, %c0_i32_0 : i32, i32
  }
  func.func @transform_3(%arg0: i32, %arg1: i32) -> (i32, i32) {
    %c0_i32 = arith.constant 0 : i32
    %c0_i32_0 = arith.constant 0 : i32
    %c0_i32_1 = arith.constant 0 : i32
    return %c0_i32, %c0_i32_0 : i32, i32
  }
  func.func @transform_4(%arg0: i32, %arg1: i32) -> (i32, i32) {
    %c0_i32 = arith.constant 0 : i32
    %c0_i32_0 = arith.constant 0 : i32
    %c0_i32_1 = arith.constant 0 : i32
    return %c0_i32, %c0_i32_0 : i32, i32
  }
  func.func @transform_5(%arg0: i32, %arg1: i32) -> (i32, i32) {
    %c0_i32 = arith.constant 0 : i32
    %c0_i32_0 = arith.constant 0 : i32
    %c0_i32_1 = arith.constant 0 : i32
    return %c0_i32, %c0_i32_0 : i32, i32
  }
  func.func @transform_6(%arg0: i32, %arg1: i32) -> (i32, i32) {
    %c0_i32 = arith.constant 0 : i32
    %c0_i32_0 = arith.constant 0 : i32
    return %arg1, %c0_i32 : i32, i32
  }
}

</mosaic_0001>

<bundles_post_ra>
// kernel: tpu_custom_call.1
= control target key start
LH: loop header
LB: loop body
LE: loop exit
PB: predicated region body
PF: predicated region fallthrough
CT: control target
= control target key end

     0   :  { %11 = vsyncpa [#allocation4], 0  ;;  %s3487_s0 = inlined_call_operand.hbm [shape: f32[2,529], index: 0, kind: input, shape index: {}]   ;;  %s3488_s1 = inlined_call_operand.hbm [shape: f32[529,512], index: 1, kind: input, shape index: {}]   ;;  %s3489_s2 = inlined_call_operand.vmem [shape: f32[512,32], index: 2, kind: input, shape index: {}]   ;;  %s3490_s3 = inlined_call_operand.hbm [shape: f32[32,512], index: 3, kind: input, shape index: {}]   ;;  %s3491_s4 = inlined_call_operand.hbm [shape: f32[2,32], index: 4, kind: input, shape index: {}]   ;;  %s3492_s5 = inlined_call_operand.vmem [shape: f32[513,1], index: 5, kind: input, shape index: {}]   ;;  %s3493_s6 = inlined_call_operand.vmem [shape: f32[2,1], index: 6, kind: output, shape index: {}]  }
   0x1   :  { %12 = vsyncpa [#allocation6], 0 }
   0x2   :  { %13 = vsyncpa [#allocation9], 0  ;;  %s2654_s21 = smov 0   ;;  %s2656_s22 = smov 0  }
   0x3   :  { %s2658_s23 = smov 0  }
   0x4 LB: > { %s2608_s24 = smov [#allocation5]   ;;  %s2153_s26 = sadd.s32 4294967295, %s2606_s23   ;;  %s2606_s23 = sphi %s2658_s23, %s19_s23   ;;  %s2602_s22 = sphi %s2656_s22, %s3544_s22   ;;  %s2598_s21 = sphi %s2654_s21, %s3543_s21  }
   0x5   : > { %s219_s25 = sshll.u32 %s2608_s24, 4  ;;  %p2154_p0 = scmp.ge.s32.totalorder %s2606_s23, 1  ;;  %s220_s25 = int_to_ptr.vmem [resolvable:$true] %s219_s25 }
   0x6   : > { %p193_p1 = scmp.lt.s32.totalorder %s2606_s23, 3  ;;  %p2672_p2 = scmp.eq.s32.totalorder %s2153_s26, 0 }
   0x7   : > { %s31_s30 = sadd.s32 1, %s2602_s22  ;;  %s2609_s8 = smov [#allocation3]  }
   0x8   : > { %p2676_p3 = pnand %p2154_p0, %p193_p1  ;;  %p2689_p6 = scmp.ge.s32.totalorder %s31_s30, 2 }
   0x9   : > { %s209_s9 = sshll.u32 %s2609_s8, 4  ;;  %s2479_s10 = scalar_lea.vmem %s220_s25, 34304  ;;  %s210_s9 = int_to_ptr.vmem [resolvable:$true] %s209_s9 }
   0xa   : > { %p2409_p4 = pneg %p2676_p3  ;;  %p2480_p8 = scmp.ne.s32.totalorder %s220_s25, %s2479_s10 }
   0xb   : > { %p2487_p11 = scmp.lt.s32.totalorder %s220_s25, %s220_s25  ;;  %p2488_p12 = scmp.lt.s32.totalorder %s2479_s10, %s2479_s10 }
   0xc   : > { %p2684_p5 = pnand %p2672_p2, %p2409_p4 }
   0xd   : > { %p2489_p13 = por %p2488_p12, %p2487_p11 }
   0xe   : > { %p2470_p7 = pneg %p2684_p5 }
  0x10   : > { %p2482_p9 = pnand %p2480_p8, %p2470_p7 }
  0x12   : > { %p2483_p10 = pneg %p2482_p9 }
  0x14   : > { %p2490_p0 = pnand %p2489_p13, %p2483_p10 }
  0x16   : > { %2493 = shalt.err (!%p2490_p0)
}
  0x17   : > { %s2610_s11 = smov 512   ;;  %s2611_s12 = smov 32  }
  0x18   : > { %2415 = dma.hbm_to_vmem [thread:$0]  (!%p2684_p5), %s3488_s1, 34304, %s220_s25, [#allocation6], %s2610_s11, %s2610_s11, %s2611_s12  }
  0x19   : > { %s3546_s30 = smov (%p2689_p6, %s31_s30), 0  ;;  %s2505_s15 = scalar_lea.vmem %s210_s9, 160 }
  0x1a   : > { %p2506_p1 = scmp.ne.s32.totalorder %s210_s9, %s2505_s15  ;;  %p2513_p9 = scmp.lt.s32.totalorder %s210_s9, %s210_s9 }
  0x1b   : > { %p2514_p10 = scmp.lt.s32.totalorder %s2505_s15, %s2505_s15 }
  0x1c   : > { %p2508_p4 = pnand %p2506_p1, %p2470_p7 }
  0x1d   : > { %p2515_p11 = por %p2514_p10, %p2513_p9 }
  0x1e   : > { %p2509_p8 = pneg %p2508_p4 }
  0x20   : > { %p2516_p12 = pnand %p2515_p11, %p2509_p8 }
  0x22   : > { %2519 = shalt.err (!%p2516_p12)
}
  0x23   : > { %2412 = dma.hbm_to_vmem [thread:$0]  (!%p2684_p5), %s3487_s0, 160, %s210_s9, [#allocation4]  }
  0x24   : > { %s2612_s18 = smov [#allocation7]   ;;  %s2613_s20 = smov [#allocation8]  }
  0x25   : > { %s235_s19 = sshll.u32 %s2612_s18, 4  ;;  %s249_s24 = sshll.u32 %s2613_s20, 4  ;;  %s236_s19 = int_to_ptr.vmem [resolvable:$true] %s235_s19  ;;  %s250_s24 = int_to_ptr.vmem [resolvable:$true] %s249_s24 }
  0x26   : > { %s2531_s25 = scalar_lea.vmem %s236_s19, 2048  ;;  %p2539_p1 = scmp.lt.s32.totalorder %s236_s19, %s236_s19 }
  0x27   : > { %p2532_p6 = scmp.ne.s32.totalorder %s236_s19, %s2531_s25  ;;  %p2540_p4 = scmp.lt.s32.totalorder %s2531_s25, %s2531_s25 }
  0x29   : > { %p2534_p13 = pnand %p2532_p6, %p2470_p7  ;;  %p2541_p8 = por %p2540_p4, %p2539_p1 }
  0x2b   : > { %p2535_p0 = pneg %p2534_p13 }
  0x2d   : > { %p2542_p9 = pnand %p2541_p8, %p2535_p0 }
  0x2f   : > { %2545 = shalt.err (!%p2542_p9)
}
  0x30   : > { %2418 = dma.hbm_to_vmem [thread:$0]  (!%p2684_p5), %s3490_s3, 2048, %s236_s19, [#allocation6], %s2610_s11, %s2610_s11, %s2611_s12  }
  0x31   : > { %s2557_s8 = scalar_lea.vmem %s250_s24, 32  ;;  %p2565_p6 = scmp.lt.s32.totalorder %s250_s24, %s250_s24 }
  0x32   : > { %p2558_p10 = scmp.ne.s32.totalorder %s250_s24, %s2557_s8  ;;  %p2566_p13 = scmp.lt.s32.totalorder %s2557_s8, %s2557_s8 }
  0x34   : > { %p2560_p11 = pnand %p2558_p10, %p2470_p7  ;;  %p2567_p0 = por %p2566_p13, %p2565_p6 }
  0x36   : > { %p2561_p12 = pneg %p2560_p11 }
  0x38   : > { %p2568_p1 = pnand %p2567_p0, %p2561_p12 }
  0x3a   : > { %2571 = shalt.err (!%p2568_p1)
}
  0x3b   : > { %2421 = dma.hbm_to_vmem [thread:$0]  (!%p2684_p5), %s3491_s4, 32, %s250_s24, [#allocation9]  }
  0x3c   : > { %265 = sbr.rel (%p2676_p3) target bundleno = 1146 (0x47a), region = 44 }
  0x41   : > { %2585 = dma.done.wait (%p2672_p2), [#allocation4], 160  }
  0x42   : > { %2587 = vsyncadd (%p2672_p2), [#allocation4], 4294967136 }
  0x43   : > { %2589 = dma.done.wait (%p2672_p2), [#allocation6], 36352  }
  0x44   : > { %2591 = vsyncadd (%p2672_p2), [#allocation6], 4294930944 }
  0x45   : > { %2593 = dma.done.wait (%p2672_p2), [#allocation9], 32  }
  0x46   : > { %2595 = vsyncadd (%p2672_p2), [#allocation9], 4294967264  ;;  %v368_v0 = vld [vmem:[#allocation5 + $0x1e8] sm:$0xff]  ;;  %v367_v2 = vld [vmem:[#allocation5 + $0x1e0] sm:$0xff]  ;;  %vm608_vm0 = vcmask 1040384   ;;  %vm605_vm1 = vcmask 138240  }
  0x47   : > { %v496_v1 = vld [vmem:[#allocation5 + $0x5e8] sm:$0xff]  ;;  %621 = vmatprep.subr.mxu0 %v368_v0  ;;  %v495_v3 = vld [vmem:[#allocation5 + $0x5e0] sm:$0xff]  ;;  %p1047_p2 = scmp.eq.s32.totalorder %s2598_s21, 0 }
  0x48   : > { %692 = vmatprep.subr.mxu1 %v496_v1  ;;  %v364_v4 = vld [vmem:[#allocation5 + $0x1c8] sm:$0xff]  ;;  %622 = vmatpush1.msra.mxu0 %v367_v2  ;;  %v363_v6 = vld [vmem:[#allocation5 + $0x1c0] sm:$0xff]  ;;  %vm1053_vm2 = vcmask (%p1047_p2), 254976  }
  0x49   : > { %v492_v5 = vld [vmem:[#allocation5 + $0x5c8] sm:$0xff]  ;;  %693 = vmatpush1.msra.mxu1 %v495_v3  ;;  %v491_v7 = vld [vmem:[#allocation5 + $0x5c0] sm:$0xff]  ;;  %623 = vmatprep.subr.mxu0 %v364_v4 }
  0x4a   : > { %v360_v8 = vld [vmem:[#allocation5 + $0x1a8] sm:$0xff]  ;;  %694 = vmatprep.subr.mxu1 %v492_v5  ;;  %v359_v10 = vld [vmem:[#allocation5 + $0x1a0] sm:$0xff]  ;;  %624 = vmatpush1.msra.mxu0 %v363_v6 }
  0x4b   : > { %v488_v9 = vld [vmem:[#allocation5 + $0x5a8] sm:$0xff]  ;;  %v487_v11 = vld [vmem:[#allocation5 + $0x5a0] sm:$0xff]  ;;  %695 = vmatpush1.msra.mxu1 %v491_v7  ;;  %625 = vmatprep.subr.mxu0 %v360_v8 }
  0x4c   : > { %v356_v12 = vld [vmem:[#allocation5 + $0x188] sm:$0xff]  ;;  %696 = vmatprep.subr.mxu1 %v488_v9  ;;  %v355_v14 = vld [vmem:[#allocation5 + $0x180] sm:$0xff]  ;;  %626 = vmatpush1.msra.mxu0 %v359_v10 }
  0x4d   : > { %v484_v13 = vld [vmem:[#allocation5 + $0x588] sm:$0xff]  ;;  %v483_v15 = vld [vmem:[#allocation5 + $0x580] sm:$0xff]  ;;  %697 = vmatpush1.msra.mxu1 %v487_v11  ;;  %627 = vmatprep.subr.mxu0 %v356_v12 }
  0x4e   : > { %v352_v16 = vld [vmem:[#allocation5 + $0x168] sm:$0xff]  ;;  %698 = vmatprep.subr.mxu1 %v484_v13  ;;  %v351_v18 = vld [vmem:[#allocation5 + $0x160] sm:$0xff]  ;;  %628 = vmatpush1.msra.mxu0 %v355_v14 }
  0x4f   : > { %v480_v17 = vld [vmem:[#allocation5 + $0x568] sm:$0xff]  ;;  %v479_v19 = vld [vmem:[#allocation5 + $0x560] sm:$0xff]  ;;  %699 = vmatpush1.msra.mxu1 %v483_v15  ;;  %629 = vmatprep.subr.mxu0 %v352_v16 }
  0x50   : > { %v348_v20 = vld [vmem:[#allocation5 + $0x148] sm:$0xff]  ;;  %700 = vmatprep.subr.mxu1 %v480_v17  ;;  %v347_v22 = vld [vmem:[#allocation5 + $0x140] sm:$0xff]  ;;  %630 = vmatpush1.msra.mxu0 %v351_v18 }
  0x51   : > { %v476_v21 = vld [vmem:[#allocation5 + $0x548] sm:$0xff]  ;;  %v475_v23 = vld [vmem:[#allocation5 + $0x540] sm:$0xff]  ;;  %701 = vmatpush1.msra.mxu1 %v479_v19  ;;  %631 = vmatprep.subr.mxu0 %v348_v20 }
  0x52   : > { %v344_v24 = vld [vmem:[#allocation5 + $0x128] sm:$0xff]  ;;  %702 = vmatprep.subr.mxu1 %v476_v21  ;;  %v343_v26 = vld [vmem:[#allocation5 + $0x120] sm:$0xff]  ;;  %632 = vmatpush1.msra.mxu0 %v347_v22 }
  0x53   : > { %v472_v25 = vld [vmem:[#allocation5 + $0x528] sm:$0xff]  ;;  %v471_v27 = vld [vmem:[#allocation5 + $0x520] sm:$0xff]  ;;  %703 = vmatpush1.msra.mxu1 %v475_v23  ;;  %633 = vmatprep.subr.mxu0 %v344_v24 }
  0x54   : > { %v340_v28 = vld [vmem:[#allocation5 + $0x108] sm:$0xff]  ;;  %704 = vmatprep.subr.mxu1 %v472_v25  ;;  %v339_v30 = vld [vmem:[#allocation5 + $0x100] sm:$0xff]  ;;  %634 = vmatpush1.msra.mxu0 %v343_v26 }
  0x55   : > { %v468_v29 = vld [vmem:[#allocation5 + $0x508] sm:$0xff]  ;;  %v467_v31 = vld [vmem:[#allocation5 + $0x500] sm:$0xff]  ;;  %705 = vmatpush1.msra.mxu1 %v471_v27  ;;  %635 = vmatprep.subr.mxu0 %v340_v28 }
  0x56   : > { %v336_v32 = vld [vmem:[#allocation5 + $0xe8] sm:$0xff]  ;;  %706 = vmatprep.subr.mxu1 %v468_v29  ;;  %v335_v34 = vld [vmem:[#allocation5 + $0xe0] sm:$0xff]  ;;  %636 = vmatpush1.msra.mxu0 %v339_v30  ;;  %v2614_v30 = vmov 1983009808  }
  0x57   : > { %v464_v33 = vld [vmem:[#allocation5 + $0x4e8] sm:$0xff]  ;;  %v463_v35 = vld [vmem:[#allocation5 + $0x4e0] sm:$0xff]  ;;  %707 = vmatpush1.msra.mxu1 %v467_v31  ;;  %637 = vmatprep.subr.mxu0 %v336_v32  ;;  %v579_v31 = vunpack.c.l.s4 %v2614_v30  ;;  %v581_v32 = vlaneseq  ;;  %v354_v30 = vld [vmem:[#allocation5 + $0x178] sm:$0xff] }
  0x58   : > { %v332_v36 = vld [vmem:[#allocation5 + $0xc8] sm:$0xff]  ;;  %708 = vmatprep.subr.mxu1 %v464_v33  ;;  %v331_v38 = vld [vmem:[#allocation5 + $0xc0] sm:$0xff]  ;;  %638 = vmatpush1.msra.mxu0 %v335_v34 }
  0x59   : > { %v460_v37 = vld [vmem:[#allocation5 + $0x4c8] sm:$0xff]  ;;  %v459_v39 = vld [vmem:[#allocation5 + $0x4c0] sm:$0xff]  ;;  %709 = vmatpush1.msra.mxu1 %v463_v35  ;;  %639 = vmatprep.subr.mxu0 %v332_v36 }
  0x5a   : > { %v328_v40 = vld [vmem:[#allocation5 + $0xa8] sm:$0xff]  ;;  %710 = vmatprep.subr.mxu1 %v460_v37  ;;  %v327_v42 = vld [vmem:[#allocation5 + $0xa0] sm:$0xff]  ;;  %640 = vmatpush1.msra.mxu0 %v331_v38 }
  0x5b   : > { %v456_v41 = vld [vmem:[#allocation5 + $0x4a8] sm:$0xff]  ;;  %v455_v43 = vld [vmem:[#allocation5 + $0x4a0] sm:$0xff]  ;;  %711 = vmatpush1.msra.mxu1 %v459_v39  ;;  %641 = vmatprep.subr.mxu0 %v328_v40 }
  0x5c   : > { %v324_v44 = vld [vmem:[#allocation5 + $0x88] sm:$0xff]  ;;  %712 = vmatprep.subr.mxu1 %v456_v41  ;;  %v323_v46 = vld [vmem:[#allocation5 + $0x80] sm:$0xff]  ;;  %642 = vmatpush1.msra.mxu0 %v327_v42  ;;  %v580_v41 = vunpack.c.0.s8 %v579_v31  ;;  %v2751_v42 = vshrl.u32 %v581_v32, 7  ;;  %v494_v31 = vld [vmem:[#allocation5 + $0x5d8] sm:$0xff] }
  0x5d   : > { %v452_v45 = vld [vmem:[#allocation5 + $0x488] sm:$0xff]  ;;  %v451_v47 = vld [vmem:[#allocation5 + $0x480] sm:$0xff]  ;;  %713 = vmatpush1.msra.mxu1 %v455_v43  ;;  %643 = vmatprep.subr.mxu0 %v324_v44  ;;  %v353_v32 = vld [vmem:[#allocation5 + $0x170] sm:$0xff] }
  0x5e   : > { %v320_v48 = vld [vmem:[#allocation5 + $0x68] sm:$0xff]  ;;  %714 = vmatprep.subr.mxu1 %v452_v45  ;;  %v319_v50 = vld [vmem:[#allocation5 + $0x60] sm:$0xff]  ;;  %644 = vmatpush1.msra.mxu0 %v323_v46  ;;  %3513 = vst [vmem:[#allocation13_spill] sm:$0xff] %v2751_v42 }
  0x5f   : > { %v448_v49 = vld [vmem:[#allocation5 + $0x468] sm:$0xff]  ;;  %v447_v51 = vld [vmem:[#allocation5 + $0x460] sm:$0xff]  ;;  %715 = vmatpush1.msra.mxu1 %v451_v47  ;;  %645 = vmatprep.subr.mxu0 %v320_v48  ;;  %v305_v47 = vld [vmem:[#allocation3] sm:$0xff] }
  0x60   : > { %v316_v52 = vld [vmem:[#allocation5 + $0x48] sm:$0xff]  ;;  %716 = vmatprep.subr.mxu1 %v448_v49  ;;  %v315_v54 = vld [vmem:[#allocation5 + $0x40] sm:$0xff]  ;;  %646 = vmatpush1.msra.mxu0 %v319_v50 }
  0x61   : > { %v444_v53 = vld [vmem:[#allocation5 + $0x448] sm:$0xff]  ;;  %v443_v55 = vld [vmem:[#allocation5 + $0x440] sm:$0xff]  ;;  %717 = vmatpush1.msra.mxu1 %v447_v51  ;;  %647 = vmatprep.subr.mxu0 %v316_v52  ;;  %v583_v52 = vsub.s32 %v580_v41, %v2751_v42  ;;  %v485_v41 = vld [vmem:[#allocation5 + $0x590] sm:$0xff] }
  0x62   : > { %v312_v56 = vld [vmem:[#allocation5 + $0x28] sm:$0xff]  ;;  %718 = vmatprep.subr.mxu1 %v444_v53  ;;  %v311_v58 = vld [vmem:[#allocation5 + $0x20] sm:$0xff]  ;;  %648 = vmatpush1.msra.mxu0 %v315_v54 }
  0x63   : > { %v440_v57 = vld [vmem:[#allocation5 + $0x428] sm:$0xff]  ;;  %v439_v59 = vld [vmem:[#allocation5 + $0x420] sm:$0xff]  ;;  %719 = vmatpush1.msra.mxu1 %v443_v55  ;;  %649 = vmatprep.subr.mxu0 %v312_v56  ;;  %v577_v55 = vcombine.high %v305_v47, %v305_v47 }
  0x64   : > { %v308_v60 = vld [vmem:[#allocation5 + $0x8] sm:$0xff]  ;;  %720 = vmatprep.subr.mxu1 %v440_v57  ;;  %v307_v62 = vld [vmem:[#allocation5] sm:$0xff]  ;;  %650 = vmatpush1.msra.mxu0 %v311_v58 }
  0x65   : > { %v436_v61 = vld [vmem:[#allocation5 + $0x408] sm:$0xff]  ;;  %v435_v63 = vld [vmem:[#allocation5 + $0x400] sm:$0xff]  ;;  %721 = vmatpush1.msra.mxu1 %v439_v59  ;;  %651 = vmatprep.subr.mxu0 %v308_v60 }
  0x66   : > { %v432_v0 = vld [vmem:[#allocation5 + $0x3e8] sm:$0xff]  ;;  %722 = vmatprep.subr.mxu1 %v436_v61  ;;  %v431_v2 = vld [vmem:[#allocation5 + $0x3e0] sm:$0xff]  ;;  %652 = vmatpush1.msra.mxu0 %v307_v62  ;;  %v2754_v62 = vrot.slane %v305_v47, %v583_v52  ;;  %v338_v47 = vld [vmem:[#allocation5 + $0xf8] sm:$0xff] }
  0x67   : > { %v560_v1 = vld [vmem:[#allocation5 + $0x7e8] sm:$0xff]  ;;  %v559_v3 = vld [vmem:[#allocation5 + $0x7e0] sm:$0xff]  ;;  %723 = vmatpush1.msra.mxu1 %v435_v63  ;;  %653 = vmatprep.subr.mxu0 %v432_v0 }
  0x68   : > { %v428_v4 = vld [vmem:[#allocation5 + $0x3c8] sm:$0xff]  ;;  %724 = vmatprep.subr.mxu1 %v560_v1  ;;  %v427_v6 = vld [vmem:[#allocation5 + $0x3c0] sm:$0xff]  ;;  %654 = vmatpush2.msra.mxu0 %v431_v2  ;;  %v2756_v1 = vrot.slane %v577_v55, %v583_v52  ;;  %v474_v52 = vld [vmem:[#allocation5 + $0x538] sm:$0xff] }
  0x69   : > { %v556_v5 = vld [vmem:[#allocation5 + $0x7c8] sm:$0xff]  ;;  %v555_v7 = vld [vmem:[#allocation5 + $0x7c0] sm:$0xff]  ;;  %725 = vmatpush2.msra.mxu1 %v559_v3  ;;  %655 = vmatprep.subr.mxu0 %v428_v4  ;;  %v330_v55 = vld [vmem:[#allocation5 + $0xb8] sm:$0xff] }
  0x6a   : > { %v424_v8 = vld [vmem:[#allocation5 + $0x3a8] sm:$0xff]  ;;  %726 = vmatprep.subr.mxu1 %v556_v5  ;;  %v423_v10 = vld [vmem:[#allocation5 + $0x3a0] sm:$0xff]  ;;  %656 = vmatpush2.msra.mxu0 %v427_v6 }
  0x6b   : > { %v552_v9 = vld [vmem:[#allocation5 + $0x7a8] sm:$0xff]  ;;  %v551_v11 = vld [vmem:[#allocation5 + $0x7a0] sm:$0xff]  ;;  %727 = vmatpush2.msra.mxu1 %v555_v7  ;;  %657 = vmatprep.subr.mxu0 %v424_v8  ;;  %v2760_v8 = vcombine.high %v2754_v62, %v2754_v62 }
  0x6c   : > { %v420_v12 = vld [vmem:[#allocation5 + $0x388] sm:$0xff]  ;;  %728 = vmatprep.subr.mxu1 %v552_v9  ;;  %v419_v14 = vld [vmem:[#allocation5 + $0x380] sm:$0xff]  ;;  %658 = vmatpush2.msra.mxu0 %v423_v10  ;;  %v2764_v10 = vcombine.high %v2756_v1, %v2756_v1 }
  0x6d   : > { %v548_v13 = vld [vmem:[#allocation5 + $0x788] sm:$0xff]  ;;  %v547_v15 = vld [vmem:[#allocation5 + $0x780] sm:$0xff]  ;;  %729 = vmatpush2.msra.mxu1 %v551_v11  ;;  %659 = vmatprep.subr.mxu0 %v420_v12 }
  0x6e   : > { %v416_v16 = vld [vmem:[#allocation5 + $0x368] sm:$0xff]  ;;  %730 = vmatprep.subr.mxu1 %v548_v13  ;;  %v415_v18 = vld [vmem:[#allocation5 + $0x360] sm:$0xff]  ;;  %660 = vmatpush2.msra.mxu0 %v419_v14  ;;  %v370_v13 = vld [vmem:[#allocation5 + $0x1f8] sm:$0xff] }
  0x6f   : > { %v544_v17 = vld [vmem:[#allocation5 + $0x768] sm:$0xff]  ;;  %v543_v19 = vld [vmem:[#allocation5 + $0x760] sm:$0xff]  ;;  %731 = vmatpush2.msra.mxu1 %v547_v15  ;;  %661 = vmatprep.subr.mxu0 %v416_v16  ;;  %v369_v15 = vld [vmem:[#allocation5 + $0x1f0] sm:$0xff] }
  0x70   : > { %v412_v20 = vld [vmem:[#allocation5 + $0x348] sm:$0xff]  ;;  %732 = vmatprep.subr.mxu1 %v544_v17  ;;  %v411_v22 = vld [vmem:[#allocation5 + $0x340] sm:$0xff]  ;;  %662 = vmatpush2.msra.mxu0 %v415_v18  ;;  %v366_v17 = vld [vmem:[#allocation5 + $0x1d8] sm:$0xff] }
  0x71   : > { %v540_v21 = vld [vmem:[#allocation5 + $0x748] sm:$0xff]  ;;  %v539_v23 = vld [vmem:[#allocation5 + $0x740] sm:$0xff]  ;;  %733 = vmatpush2.msra.mxu1 %v543_v19  ;;  %663 = vmatprep.subr.mxu0 %v412_v20  ;;  %v365_v19 = vld [vmem:[#allocation5 + $0x1d0] sm:$0xff] }
  0x72   : > { %v408_v24 = vld [vmem:[#allocation5 + $0x328] sm:$0xff]  ;;  %734 = vmatprep.subr.mxu1 %v540_v21  ;;  %v407_v26 = vld [vmem:[#allocation5 + $0x320] sm:$0xff]  ;;  %664 = vmatpush2.msra.mxu0 %v411_v22  ;;  %v362_v21 = vld [vmem:[#allocation5 + $0x1b8] sm:$0xff] }
  0x73   : > { %v536_v25 = vld [vmem:[#allocation5 + $0x728] sm:$0xff]  ;;  %v535_v27 = vld [vmem:[#allocation5 + $0x720] sm:$0xff]  ;;  %735 = vmatpush2.msra.mxu1 %v539_v23  ;;  %665 = vmatprep.subr.mxu0 %v408_v24  ;;  %v361_v23 = vld [vmem:[#allocation5 + $0x1b0] sm:$0xff] }
  0x74   : > { %v404_v28 = vld [vmem:[#allocation5 + $0x308] sm:$0xff]  ;;  %736 = vmatprep.subr.mxu1 %v536_v25  ;;  %v403_v33 = vld [vmem:[#allocation5 + $0x300] sm:$0xff]  ;;  %666 = vmatpush2.msra.mxu0 %v407_v26  ;;  %v2772_v24 = vld.sshfl [vmem:[#allocation3 + $0x8] sm:$0x3 pattern:$0x76325410] }
  0x75   : > { %v532_v29 = vld [vmem:[#allocation5 + $0x708] sm:$0xff]  ;;  %v531_v34 = vld [vmem:[#allocation5 + $0x700] sm:$0xff]  ;;  %737 = vmatpush2.msra.mxu1 %v535_v27  ;;  %667 = vmatprep.subr.mxu0 %v404_v28  ;;  %v358_v25 = vld [vmem:[#allocation5 + $0x198] sm:$0xff]  ;;  %v2615_v27 = vmov 0.0  }
  0x76   : > { %v400_v35 = vld [vmem:[#allocation5 + $0x2e8] sm:$0xff]  ;;  %738 = vmatprep.subr.mxu1 %v532_v29  ;;  %v399_v37 = vld [vmem:[#allocation5 + $0x2e0] sm:$0xff]  ;;  %668 = vmatpush2.msra.mxu0 %v403_v33  ;;  %v498_v26 = vld [vmem:[#allocation5 + $0x5f8] sm:$0xff] }
  0x77   : > { %v528_v36 = vld [vmem:[#allocation5 + $0x6e8] sm:$0xff]  ;;  %v527_v38 = vld [vmem:[#allocation5 + $0x6e0] sm:$0xff]  ;;  %739 = vmatpush2.msra.mxu1 %v531_v34  ;;  %669 = vmatprep.subr.mxu0 %v400_v35  ;;  %v357_v28 = vld [vmem:[#allocation5 + $0x190] sm:$0xff] }
  0x78   : > { %v396_v39 = vld [vmem:[#allocation5 + $0x2c8] sm:$0xff]  ;;  %740 = vmatprep.subr.mxu1 %v528_v36  ;;  %v395_v43 = vld [vmem:[#allocation5 + $0x2c0] sm:$0xff]  ;;  %670 = vmatpush2.msra.mxu0 %v399_v37  ;;  %v497_v29 = vld [vmem:[#allocation5 + $0x5f0] sm:$0xff] }
  0x79   : > { %v524_v40 = vld [vmem:[#allocation5 + $0x6c8] sm:$0xff]  ;;  %v523_v44 = vld [vmem:[#allocation5 + $0x6c0] sm:$0xff]  ;;  %741 = vmatpush2.msra.mxu1 %v527_v38  ;;  %671 = vmatprep.subr.mxu0 %v396_v39  ;;  %v493_v33 = vld [vmem:[#allocation5 + $0x5d0] sm:$0xff] }
  0x7a   : > { %v392_v45 = vld [vmem:[#allocation5 + $0x2a8] sm:$0xff]  ;;  %742 = vmatprep.subr.mxu1 %v524_v40  ;;  %v391_v48 = vld [vmem:[#allocation5 + $0x2a0] sm:$0xff]  ;;  %672 = vmatpush2.msra.mxu0 %v395_v43  ;;  %v350_v34 = vld [vmem:[#allocation5 + $0x158] sm:$0xff] }
  0x7b   : > { %v520_v46 = vld [vmem:[#allocation5 + $0x6a8] sm:$0xff]  ;;  %v519_v49 = vld [vmem:[#allocation5 + $0x6a0] sm:$0xff]  ;;  %743 = vmatpush2.msra.mxu1 %v523_v44  ;;  %673 = vmatprep.subr.mxu0 %v392_v45  ;;  %v490_v35 = vld [vmem:[#allocation5 + $0x5b8] sm:$0xff] }
  0x7c   : > { %v388_v50 = vld [vmem:[#allocation5 + $0x288] sm:$0xff]  ;;  %744 = vmatprep.subr.mxu1 %v520_v46  ;;  %v387_v53 = vld [vmem:[#allocation5 + $0x280] sm:$0xff]  ;;  %674 = vmatpush2.msra.mxu0 %v391_v48  ;;  %v349_v36 = vld [vmem:[#allocation5 + $0x150] sm:$0xff] }
  0x7d   : > { %v516_v51 = vld [vmem:[#allocation5 + $0x688] sm:$0xff]  ;;  %v515_v54 = vld [vmem:[#allocation5 + $0x680] sm:$0xff]  ;;  %745 = vmatpush2.msra.mxu1 %v519_v49  ;;  %675 = vmatprep.subr.mxu0 %v388_v50  ;;  %v489_v37 = vld [vmem:[#allocation5 + $0x5b0] sm:$0xff] }
  0x7e   : > { %v384_v56 = vld [vmem:[#allocation5 + $0x268] sm:$0xff]  ;;  %746 = vmatprep.subr.mxu1 %v516_v51  ;;  %v383_v58 = vld [vmem:[#allocation5 + $0x260] sm:$0xff]  ;;  %676 = vmatpush2.msra.mxu0 %v387_v53  ;;  %v346_v38 = vld [vmem:[#allocation5 + $0x138] sm:$0xff] }
  0x7f   : > { %v512_v57 = vld [vmem:[#allocation5 + $0x668] sm:$0xff]  ;;  %v511_v59 = vld [vmem:[#allocation5 + $0x660] sm:$0xff]  ;;  %747 = vmatpush2.msra.mxu1 %v515_v54  ;;  %677 = vmatprep.subr.mxu0 %v384_v56  ;;  %v486_v39 = vld [vmem:[#allocation5 + $0x598] sm:$0xff] }
  0x80   : > { %v380_v60 = vld [vmem:[#allocation5 + $0x248] sm:$0xff]  ;;  %748 = vmatprep.subr.mxu1 %v512_v57  ;;  %v379_v63 = vld [vmem:[#allocation5 + $0x240] sm:$0xff]  ;;  %678 = vmatpush2.msra.mxu0 %v383_v58  ;;  %v345_v40 = vld [vmem:[#allocation5 + $0x130] sm:$0xff] }
  0x81   : > { %v508_v61 = vld [vmem:[#allocation5 + $0x648] sm:$0xff]  ;;  %v507_v0 = vld [vmem:[#allocation5 + $0x640] sm:$0xff]  ;;  %749 = vmatpush2.msra.mxu1 %v511_v59  ;;  %679 = vmatprep.subr.mxu0 %v380_v60  ;;  %v342_v43 = vld [vmem:[#allocation5 + $0x118] sm:$0xff] }
  0x82   : > { %v376_v2 = vld [vmem:[#allocation5 + $0x228] sm:$0xff]  ;;  %750 = vmatprep.subr.mxu1 %v508_v61  ;;  %v375_v4 = vld [vmem:[#allocation5 + $0x220] sm:$0xff]  ;;  %680 = vmatpush2.msra.mxu0 %v379_v63  ;;  %v482_v44 = vld [vmem:[#allocation5 + $0x578] sm:$0xff] }
  0x83   : > { %v504_v3 = vld [vmem:[#allocation5 + $0x628] sm:$0xff]  ;;  %v503_v5 = vld [vmem:[#allocation5 + $0x620] sm:$0xff]  ;;  %751 = vmatpush2.msra.mxu1 %v507_v0  ;;  %681 = vmatprep.subr.mxu0 %v376_v2  ;;  %v341_v45 = vld [vmem:[#allocation5 + $0x110] sm:$0xff] }
  0x84   : > { %v372_v6 = vld [vmem:[#allocation5 + $0x208] sm:$0xff]  ;;  %752 = vmatprep.subr.mxu1 %v504_v3  ;;  %v371_v9 = vld [vmem:[#allocation5 + $0x200] sm:$0xff]  ;;  %682 = vmatpush2.msra.mxu0 %v375_v4  ;;  %v481_v46 = vld [vmem:[#allocation5 + $0x570] sm:$0xff] }
  0x85   : > { %v500_v7 = vld [vmem:[#allocation5 + $0x608] sm:$0xff]  ;;  %753 = vmatpush2.msra.mxu1 %v503_v5  ;;  %v499_v11 = vld [vmem:[#allocation5 + $0x600] sm:$0xff]  ;;  %683 = vmatprep.subr.mxu0 %v372_v6  ;;  %v478_v48 = vld [vmem:[#allocation5 + $0x558] sm:$0xff] }
  0x86   : > { %754 = vmatprep.subr.mxu1 %v500_v7  ;;  %684 = vmatpush2.msra.mxu0 %v371_v9  ;;  %v572_v12 = vld [vmem:[#allocation5 + $0x848] sm:$0x1]  ;;  %v571_v14 = vld [vmem:[#allocation5 + $0x840] sm:$0x1]  ;;  %v337_v49 = vld [vmem:[#allocation5 + $0xf0] sm:$0xff] }
  0x87   : > { %685 = vmatprep.mubr.f32.mxu0 %v2760_v8  ;;  %755 = vmatpush2.msra.mxu1 %v499_v11  ;;  %v568_v16 = vld [vmem:[#allocation5 + $0x828] sm:$0xff]  ;;  %v567_v18 = vld [vmem:[#allocation5 + $0x820] sm:$0xff]  ;;  %v477_v50 = vld [vmem:[#allocation5 + $0x550] sm:$0xff] }
  0x88   : > { %756 = vmatprep.mubr.f32.mxu1 %v2764_v10  ;;  %686 = vmatmul.mubr.f32.vlgmr.msra.gmra.mxu0 %v2754_v62  ;;  %v564_v20 = vld [vmem:[#allocation5 + $0x808] sm:$0xff]  ;;  %v563_v22 = vld [vmem:[#allocation5 + $0x800] sm:$0xff]  ;;  %v334_v51 = vld [vmem:[#allocation5 + $0xd8] sm:$0xff] }
  0x89   : > { %757 = vmatmul.mubr.f32.vlgmr.msra.gmra.mxu1 %v2756_v1  ;;  %2165 = vmatprep.subr.msk.mxu0 %vm608_vm0, %v572_v12  ;;  %v333_v53 = vld [vmem:[#allocation5 + $0xd0] sm:$0xff]  ;;  %v470_v56 = vld [vmem:[#allocation5 + $0x518] sm:$0xff] }
  0x8a   : > { %834 = vmatprep.subr.mxu1 %v370_v13  ;;  %2166 = vmatpush1.msk.msra.mxu0 %vm608_vm0, %v571_v14  ;;  %v473_v54 = vld [vmem:[#allocation5 + $0x530] sm:$0xff]  ;;  %v326_v59 = vld [vmem:[#allocation5 + $0x98] sm:$0xff] }
  0x8b   : > { %835 = vmatpush1.msra.mxu1 %v369_v15  ;;  %791 = vmatprep.subr.mxu0 %v568_v16  ;;  %v329_v57 = vld [vmem:[#allocation5 + $0xb0] sm:$0xff]  ;;  %v466_v60 = vld [vmem:[#allocation5 + $0x4f8] sm:$0xff] }
  0x8c   : > { %836 = vmatprep.subr.mxu1 %v366_v17  ;;  %792 = vmatpush1.msra.mxu0 %v567_v18  ;;  %v469_v58 = vld [vmem:[#allocation5 + $0x510] sm:$0xff]  ;;  %v322_v0 = vld [vmem:[#allocation5 + $0x78] sm:$0xff] }
  0x8d   : > { %837 = vmatpush1.msra.mxu1 %v365_v19  ;;  %793 = vmatprep.subr.mxu0 %v564_v20  ;;  %v325_v61 = vld [vmem:[#allocation5 + $0x90] sm:$0xff]  ;;  %v462_v2 = vld [vmem:[#allocation5 + $0x4d8] sm:$0xff] }
  0x8e   : > { %838 = vmatprep.subr.mxu1 %v362_v21  ;;  %794 = vmatpush1.msra.mxu0 %v563_v22  ;;  %v465_v63 = vld [vmem:[#allocation5 + $0x4f0] sm:$0xff]  ;;  %v318_v5 = vld [vmem:[#allocation5 + $0x58] sm:$0xff] }
  0x8f   : > { %827 = vmatprep.mubr.f32.mxu0 %v2615_v27  ;;  %839 = vmatpush1.msra.mxu1 %v361_v23  ;;  %v321_v3 = vld [vmem:[#allocation5 + $0x70] sm:$0xff]  ;;  %v458_v6 = vld [vmem:[#allocation5 + $0x4b8] sm:$0xff] }
  0x90   : > { %2167 = vmatmul.mubr.msk.f32.vlgmr.msra.gmra.mxu0 %vm605_vm1, %v2772_v24  ;;  %840 = vmatprep.subr.mxu1 %v358_v25  ;;  %v461_v4 = vld [vmem:[#allocation5 + $0x4d0] sm:$0xff]  ;;  %v314_v11 = vld [vmem:[#allocation5 + $0x38] sm:$0xff] }
  0x91   : > { %905 = vmatprep.subr.mxu0 %v498_v26  ;;  %841 = vmatpush1.msra.mxu1 %v357_v28  ;;  %v317_v7 = vld [vmem:[#allocation5 + $0x50] sm:$0xff]  ;;  %v454_v12 = vld [vmem:[#allocation5 + $0x498] sm:$0xff] }
  0x92   : > { %906 = vmatpush1.msra.mxu0 %v497_v29  ;;  %842 = vmatprep.subr.mxu1 %v354_v30  ;;  %v457_v9 = vld [vmem:[#allocation5 + $0x4b0] sm:$0xff]  ;;  %v310_v15 = vld [vmem:[#allocation5 + $0x18] sm:$0xff] }
  0x93   : > { %907 = vmatprep.subr.mxu0 %v494_v31  ;;  %843 = vmatpush1.msra.mxu1 %v353_v32  ;;  %v313_v13 = vld [vmem:[#allocation5 + $0x30] sm:$0xff]  ;;  %v450_v16 = vld [vmem:[#allocation5 + $0x478] sm:$0xff] }
  0x94   : > { %908 = vmatpush1.msra.mxu0 %v493_v33  ;;  %844 = vmatprep.subr.mxu1 %v350_v34  ;;  %v453_v14 = vld [vmem:[#allocation5 + $0x490] sm:$0xff]  ;;  %v434_v19 = vld [vmem:[#allocation5 + $0x3f8] sm:$0xff] }
  0x95   : > { %909 = vmatprep.subr.mxu0 %v490_v35  ;;  %845 = vmatpush1.msra.mxu1 %v349_v36  ;;  %v309_v17 = vld [vmem:[#allocation5 + $0x10] sm:$0xff]  ;;  %v446_v20 = vld [vmem:[#allocation5 + $0x458] sm:$0xff] }
  0x96   : > { %910 = vmatpush1.msra.mxu0 %v489_v37  ;;  %846 = vmatprep.subr.mxu1 %v346_v38  ;;  %v449_v18 = vld [vmem:[#allocation5 + $0x470] sm:$0xff]  ;;  %v430_v23 = vld [vmem:[#allocation5 + $0x3d8] sm:$0xff] }
  0x97   : > { %911 = vmatprep.subr.mxu0 %v486_v39  ;;  %847 = vmatpush1.msra.mxu1 %v345_v40  ;;  %v433_v21 = vld [vmem:[#allocation5 + $0x3f0] sm:$0xff]  ;;  %v442_v25 = vld [vmem:[#allocation5 + $0x438] sm:$0xff] }
  0x98   : > { %912 = vmatpush1.msra.mxu0 %v485_v41  ;;  %848 = vmatprep.subr.mxu1 %v342_v43  ;;  %v445_v22 = vld [vmem:[#allocation5 + $0x450] sm:$0xff]  ;;  %v426_v29 = vld [vmem:[#allocation5 + $0x3b8] sm:$0xff] }
  0x99   : > { %913 = vmatprep.subr.mxu0 %v482_v44  ;;  %849 = vmatpush1.msra.mxu1 %v341_v45  ;;  %v429_v26 = vld [vmem:[#allocation5 + $0x3d0] sm:$0xff]  ;;  %v438_v30 = vld [vmem:[#allocation5 + $0x418] sm:$0xff] }
  0x9a   : > { %914 = vmatpush1.msra.mxu0 %v481_v46  ;;  %850 = vmatprep.subr.mxu1 %v338_v47  ;;  %v441_v28 = vld [vmem:[#allocation5 + $0x430] sm:$0xff]  ;;  %v422_v33 = vld [vmem:[#allocation5 + $0x398] sm:$0xff] }
  0x9b   : > { %915 = vmatprep.subr.mxu0 %v478_v48  ;;  %851 = vmatpush1.msra.mxu1 %v337_v49  ;;  %v425_v31 = vld [vmem:[#allocation5 + $0x3b0] sm:$0xff]  ;;  %v562_v34 = vld [vmem:[#allocation5 + $0x7f8] sm:$0xff] }
  0x9c   : > { %916 = vmatpush1.msra.mxu0 %v477_v50  ;;  %852 = vmatprep.subr.mxu1 %v334_v51  ;;  %v437_v32 = vld [vmem:[#allocation5 + $0x410] sm:$0xff]  ;;  %v418_v37 = vld [vmem:[#allocation5 + $0x378] sm:$0xff] }
  0x9d   : > { %917 = vmatprep.subr.mxu0 %v474_v52  ;;  %853 = vmatpush1.msra.mxu1 %v333_v53  ;;  %v421_v35 = vld [vmem:[#allocation5 + $0x390] sm:$0xff]  ;;  %v558_v38 = vld [vmem:[#allocation5 + $0x7d8] sm:$0xff] }
  0x9e   : > { %918 = vmatpush1.msra.mxu0 %v473_v54  ;;  %854 = vmatprep.subr.mxu1 %v330_v55  ;;  %v561_v36 = vld [vmem:[#allocation5 + $0x7f0] sm:$0xff]  ;;  %v414_v41 = vld [vmem:[#allocation5 + $0x358] sm:$0xff] }
  0x9f   : > { %919 = vmatprep.subr.mxu0 %v470_v56  ;;  %855 = vmatpush1.msra.mxu1 %v329_v57  ;;  %v417_v39 = vld [vmem:[#allocation5 + $0x370] sm:$0xff]  ;;  %v554_v43 = vld [vmem:[#allocation5 + $0x7b8] sm:$0xff] }
  0xa0   : > { %920 = vmatpush1.msra.mxu0 %v469_v58  ;;  %856 = vmatprep.subr.mxu1 %v326_v59  ;;  %v557_v40 = vld [vmem:[#allocation5 + $0x7d0] sm:$0xff]  ;;  %v410_v46 = vld [vmem:[#allocation5 + $0x338] sm:$0xff] }
  0xa1   : > { %921 = vmatprep.subr.mxu0 %v466_v60  ;;  %857 = vmatpush1.msra.mxu1 %v325_v61  ;;  %v413_v44 = vld [vmem:[#allocation5 + $0x350] sm:$0xff]  ;;  %v550_v47 = vld [vmem:[#allocation5 + $0x798] sm:$0xff] }
  0xa2   : > { %922 = vmatpush1.msra.mxu0 %v465_v63  ;;  %858 = vmatprep.subr.mxu1 %v322_v0  ;;  %v553_v45 = vld [vmem:[#allocation5 + $0x7b0] sm:$0xff]  ;;  %v406_v50 = vld [vmem:[#allocation5 + $0x318] sm:$0xff] }
  0xa3   : > { %923 = vmatprep.subr.mxu0 %v462_v2  ;;  %859 = vmatpush1.msra.mxu1 %v321_v3  ;;  %v409_v48 = vld [vmem:[#allocation5 + $0x330] sm:$0xff]  ;;  %v546_v51 = vld [vmem:[#allocation5 + $0x778] sm:$0xff] }
  0xa4   : > { %924 = vmatpush1.msra.mxu0 %v461_v4  ;;  %860 = vmatprep.subr.mxu1 %v318_v5  ;;  %v549_v49 = vld [vmem:[#allocation5 + $0x790] sm:$0xff]  ;;  %v402_v54 = vld [vmem:[#allocation5 + $0x2f8] sm:$0xff] }
  0xa5   : > { %925 = vmatprep.subr.mxu0 %v458_v6  ;;  %861 = vmatpush1.msra.mxu1 %v317_v7  ;;  %v405_v52 = vld [vmem:[#allocation5 + $0x310] sm:$0xff]  ;;  %v542_v55 = vld [vmem:[#allocation5 + $0x758] sm:$0xff] }
  0xa6   : > { %926 = vmatpush1.msra.mxu0 %v457_v9  ;;  %862 = vmatprep.subr.mxu1 %v314_v11  ;;  %v545_v53 = vld [vmem:[#allocation5 + $0x770] sm:$0xff]  ;;  %v398_v58 = vld [vmem:[#allocation5 + $0x2d8] sm:$0xff] }
  0xa7   : > { %927 = vmatprep.subr.mxu0 %v454_v12  ;;  %863 = vmatpush1.msra.mxu1 %v313_v13  ;;  %v401_v56 = vld [vmem:[#allocation5 + $0x2f0] sm:$0xff]  ;;  %v538_v59 = vld [vmem:[#allocation5 + $0x738] sm:$0xff] }
  0xa8   : > { %928 = vmatpush1.msra.mxu0 %v453_v14  ;;  %864 = vmatprep.subr.mxu1 %v310_v15  ;;  %v541_v57 = vld [vmem:[#allocation5 + $0x750] sm:$0xff]  ;;  %v394_v63 = vld [vmem:[#allocation5 + $0x2b8] sm:$0xff] }
  0xa9   : > { %929 = vmatprep.subr.mxu0 %v450_v16  ;;  %865 = vmatpush1.msra.mxu1 %v309_v17  ;;  %v397_v60 = vld [vmem:[#allocation5 + $0x2d0] sm:$0xff]  ;;  %v534_v0 = vld [vmem:[#allocation5 + $0x718] sm:$0xff] }
  0xaa   : > { %930 = vmatpush1.msra.mxu0 %v449_v18  ;;  %866 = vmatprep.subr.mxu1 %v434_v19  ;;  %v537_v61 = vld [vmem:[#allocation5 + $0x730] sm:$0xff]  ;;  %v390_v4 = vld [vmem:[#allocation5 + $0x298] sm:$0xff] }
  0xab   : > { %931 = vmatprep.subr.mxu0 %v446_v20  ;;  %867 = vmatpush2.msra.mxu1 %v433_v21  ;;  %v393_v2 = vld [vmem:[#allocation5 + $0x2b0] sm:$0xff]  ;;  %v530_v5 = vld [vmem:[#allocation5 + $0x6f8] sm:$0xff] }
  0xac   : > { %932 = vmatpush1.msra.mxu0 %v445_v22  ;;  %868 = vmatprep.subr.mxu1 %v430_v23  ;;  %v533_v3 = vld [vmem:[#allocation5 + $0x710] sm:$0xff]  ;;  %v386_v9 = vld [vmem:[#allocation5 + $0x278] sm:$0xff] }
  0xad   : > { %933 = vmatprep.subr.mxu0 %v442_v25  ;;  %869 = vmatpush2.msra.mxu1 %v429_v26  ;;  %v389_v6 = vld [vmem:[#allocation5 + $0x290] sm:$0xff]  ;;  %v526_v11 = vld [vmem:[#allocation5 + $0x6d8] sm:$0xff] }
  0xae   : > { %934 = vmatpush1.msra.mxu0 %v441_v28  ;;  %870 = vmatprep.subr.mxu1 %v426_v29  ;;  %v529_v7 = vld [vmem:[#allocation5 + $0x6f0] sm:$0xff]  ;;  %v382_v14 = vld [vmem:[#allocation5 + $0x258] sm:$0xff] }
  0xaf   : > { %935 = vmatprep.subr.mxu0 %v438_v30  ;;  %871 = vmatpush2.msra.mxu1 %v425_v31  ;;  %v385_v12 = vld [vmem:[#allocation5 + $0x270] sm:$0xff]  ;;  %v522_v15 = vld [vmem:[#allocation5 + $0x6b8] sm:$0xff] }
  0xb0   : > { %936 = vmatpush1.msra.mxu0 %v437_v32  ;;  %872 = vmatprep.subr.mxu1 %v422_v33  ;;  %v525_v13 = vld [vmem:[#allocation5 + $0x6d0] sm:$0xff]  ;;  %v378_v18 = vld [vmem:[#allocation5 + $0x238] sm:$0xff] }
  0xb1   : > { %937 = vmatprep.subr.mxu0 %v562_v34  ;;  %873 = vmatpush2.msra.mxu1 %v421_v35  ;;  %v381_v16 = vld [vmem:[#allocation5 + $0x250] sm:$0xff]  ;;  %v518_v19 = vld [vmem:[#allocation5 + $0x698] sm:$0xff] }
  0xb2   : > { %938 = vmatpush2.msra.mxu0 %v561_v36  ;;  %874 = vmatprep.subr.mxu1 %v418_v37  ;;  %v521_v17 = vld [vmem:[#allocation5 + $0x6b0] sm:$0xff]  ;;  %v374_v22 = vld [vmem:[#allocation5 + $0x218] sm:$0xff] }
  0xb3   : > { %939 = vmatprep.subr.mxu0 %v558_v38  ;;  %875 = vmatpush2.msra.mxu1 %v417_v39  ;;  %v377_v20 = vld [vmem:[#allocation5 + $0x230] sm:$0xff]  ;;  %v514_v23 = vld [vmem:[#allocation5 + $0x678] sm:$0xff] }
  0xb4   : > { %940 = vmatpush2.msra.mxu0 %v557_v40  ;;  %876 = vmatprep.subr.mxu1 %v414_v41  ;;  %v517_v21 = vld [vmem:[#allocation5 + $0x690] sm:$0xff]  ;;  %v510_v28 = vld [vmem:[#allocation5 + $0x658] sm:$0xff] }
  0xb5   : > { %941 = vmatprep.subr.mxu0 %v554_v43  ;;  %877 = vmatpush2.msra.mxu1 %v413_v44  ;;  %v373_v25 = vld [vmem:[#allocation5 + $0x210] sm:$0xff]  ;;  %v574_v29 = vld [vmem:[#allocation5 + $0x858] sm:$0x1] }
  0xb6   : > { %942 = vmatpush2.msra.mxu0 %v553_v45  ;;  %878 = vmatprep.subr.mxu1 %v410_v46  ;;  %v513_v26 = vld [vmem:[#allocation5 + $0x670] sm:$0xff]  ;;  %v506_v32 = vld [vmem:[#allocation5 + $0x638] sm:$0xff] }
  0xb7   : > { %943 = vmatprep.subr.mxu0 %v550_v47  ;;  %879 = vmatpush2.msra.mxu1 %v409_v48  ;;  %v509_v30 = vld [vmem:[#allocation5 + $0x650] sm:$0xff]  ;;  %v570_v33 = vld [vmem:[#allocation5 + $0x838] sm:$0xff] }
  0xb8   : > { %944 = vmatpush2.msra.mxu0 %v549_v49  ;;  %880 = vmatprep.subr.mxu1 %v406_v50  ;;  %v573_v31 = vld [vmem:[#allocation5 + $0x850] sm:$0x1]  ;;  %v502_v36 = vld [vmem:[#allocation5 + $0x618] sm:$0xff] }
  0xb9   : > { %945 = vmatprep.subr.mxu0 %v546_v51  ;;  %881 = vmatpush2.msra.mxu1 %v405_v52  ;;  %v505_v34 = vld [vmem:[#allocation5 + $0x630] sm:$0xff]  ;;  %v566_v37 = vld [vmem:[#allocation5 + $0x818] sm:$0xff] }
  0xba   : > { %946 = vmatpush2.msra.mxu0 %v545_v53  ;;  %882 = vmatprep.subr.mxu1 %v402_v54  ;;  %v569_v35 = vld [vmem:[#allocation5 + $0x830] sm:$0xff] }
  0xbb   : > { %947 = vmatprep.subr.mxu0 %v542_v55  ;;  %883 = vmatpush2.msra.mxu1 %v401_v56  ;;  %v501_v38 = vld [vmem:[#allocation5 + $0x610] sm:$0xff]  ;;  %v2616_v55 = vmov (%p1047_p2), 0.0  }
  0xbc   : > { %948 = vmatpush2.msra.mxu0 %v541_v57  ;;  %884 = vmatprep.subr.mxu1 %v398_v58  ;;  %1054 = vst.msk [vmem:[#allocation2] sm:$0x3] (%p1047_p2), %vm1053_vm2, %v2616_v55 }
  0xbd   : > { %949 = vmatprep.subr.mxu0 %v538_v59  ;;  %885 = vmatpush2.msra.mxu1 %v397_v60 }
  0xbe   : > { %950 = vmatpush2.msra.mxu0 %v537_v61  ;;  %886 = vmatprep.subr.mxu1 %v394_v63 }
  0xbf   : > { %951 = vmatprep.subr.mxu0 %v534_v0  ;;  %887 = vmatpush2.msra.mxu1 %v393_v2 }
  0xc0   : > { %952 = vmatpush2.msra.mxu0 %v533_v3  ;;  %888 = vmatprep.subr.mxu1 %v390_v4 }
  0xc1   : > { %953 = vmatprep.subr.mxu0 %v530_v5  ;;  %889 = vmatpush2.msra.mxu1 %v389_v6 }
  0xc2   : > { %954 = vmatpush2.msra.mxu0 %v529_v7  ;;  %890 = vmatprep.subr.mxu1 %v386_v9 }
  0xc3   : > { %955 = vmatprep.subr.mxu0 %v526_v11  ;;  %891 = vmatpush2.msra.mxu1 %v385_v12 }
  0xc4   : > { %956 = vmatpush2.msra.mxu0 %v525_v13  ;;  %892 = vmatprep.subr.mxu1 %v382_v14 }
  0xc5   : > { %957 = vmatprep.subr.mxu0 %v522_v15  ;;  %893 = vmatpush2.msra.mxu1 %v381_v16 }
  0xc6   : > { %958 = vmatpush2.msra.mxu0 %v521_v17  ;;  %894 = vmatprep.subr.mxu1 %v378_v18 }
  0xc7   : > { %959 = vmatprep.subr.mxu0 %v518_v19  ;;  %895 = vmatpush2.msra.mxu1 %v377_v20 }
  0xc8   : > { %960 = vmatpush2.msra.mxu0 %v517_v21  ;;  %896 = vmatprep.subr.mxu1 %v374_v22 }
  0xc9   : > { %961 = vmatprep.subr.mxu0 %v514_v23  ;;  %897 = vmatpush2.msra.mxu1 %v373_v25 }
  0xca   : > { %962 = vmatpush2.msra.mxu0 %v513_v26  ;;  %898 = vmatprep.mubr.f32.mxu1 %v2760_v8  ;;  %v565_v8 = vld [vmem:[#allocation5 + $0x810] sm:$0xff] }
  0xcb   : > { %963 = vmatprep.subr.mxu0 %v510_v28  ;;  %2168 = vmatprep.subr.msk.mxu1 %vm608_vm0, %v574_v29 }
  0xcc   : > { %899 = vmatmul.mubr.f32.vlgmr.msra.gmra.mxu1 %v2754_v62  ;;  %964 = vmatpush2.msra.mxu0 %v509_v30 }
  0xcd   : > { %2169 = vmatpush1.msk.msra.mxu1 %vm608_vm0, %v573_v31  ;;  %965 = vmatprep.subr.mxu0 %v506_v32 }
  0xce   : > { %1004 = vmatprep.subr.mxu1 %v570_v33  ;;  %966 = vmatpush2.msra.mxu0 %v505_v34 }
  0xcf   : > { %1005 = vmatpush1.msra.mxu1 %v569_v35  ;;  %967 = vmatprep.subr.mxu0 %v502_v36 }
  0xd0   : > { %1006 = vmatprep.subr.mxu1 %v566_v37  ;;  %968 = vmatpush2.msra.mxu0 %v501_v38 }
  0xd1   : > { %969 = vmatprep.mubr.f32.mxu0 %v2764_v10  ;;  %1007 = vmatpush1.msra.mxu1 %v565_v8 }
  0xd2   : > { %1040 = vmatprep.mubr.f32.mxu1 %v2615_v27  ;;  %970 = vmatmul.mubr.f32.vlgmr.msra.gmra.mxu0 %v2756_v1 }
  0xd3   : > { %2170 = vmatmul.mubr.msk.f32.vlgmr.msra.gmra.mxu1 %vm605_vm1, %v2772_v24 }
 0x148   : > { %v687_v62 = vpop.f32.mrf.mxu0 }
 0x149   : > { %v758_v39 = vpop.f32.mrf.mxu1 }
 0x14a   : > { %v689_v40 = vpop.f32.mrf.mxu0  ;;  %v759_v43 = vadd.f32 %v758_v39, %v687_v62 }
 0x14b   : > { %v760_v41 = vpop.f32.mrf.mxu1 }
 0x14c   : > { %v761_v45 = vadd.f32 %v760_v41, %v689_v40 }
 0x150   : > { %v829_v44 = vpop.f32.mrf.mxu0 }
 0x151   : > { %v2787_v46 = vadd.f32 %v829_v44, %v759_v43 }
 0x152   : > { %v831_v47 = vpop.f32.mrf.mxu0 }
 0x153   : > { %v2789_v10 = vadd.f32 %v831_v47, %v761_v45 }
 0x18c   : > { %v900_v48 = vpop.f32.mrf.mxu1 }
 0x18e   : > { %v902_v27 = vpop.f32.mrf.mxu1 }
 0x192   : > { %v971_v49 = vpop.f32.mrf.mxu0 }
 0x193   : > { %v1042_v1 = vpop.f32.mrf.mxu1  ;;  %v972_v50 = vadd.f32 %v971_v49, %v900_v48  ;;  %1052 = sbr.rel (!%p1047_p2) target bundleno = 408 (0x198), region = 64 }
 0x194   : > { %v973_v51 = vpop.f32.mrf.mxu0 }
 0x195   : > { %v2791_v24 = vadd.f32 %v1042_v1, %v972_v50  ;;  %v974_v52 = vadd.f32 %v973_v51, %v902_v27  ;;  %v1044_v53 = vpop.f32.mrf.mxu1 }
 0x197   : > { %v2793_v54 = vadd.f32 %v1044_v53, %v974_v52 }
 0x198 PF: > { %p2172_p3 = scmp.ne.s32.totalorder %s2598_s21, 0 }
 0x19a   : > { %1057 = sbr.rel (%p2172_p3) target bundleno = 690 (0x2b2), region = 68 }
 0x19f   : > { %v2801_v56 = vld [vmem:[%s3489_s2 + $0xf8] sm:$0xff]  ;;  %v2823_v60 = vld [vmem:[%s3489_s2 + $0xf0] sm:$0xff]  ;;  %v2845_v2 = vld [vmem:[%s3489_s2 + $0xe8] sm:$0xff]  ;;  %vm1058_vm3 = vcmask 1041408   ;;  %vm1471_vm4 = vcmask 1024   ;;  %vm1469_vm5 = vcmask 254976  }
 0x1a0   : > { %v2806_v57 = vld [vmem:[%s3489_s2 + $0x1f8] sm:$0xff]  ;;  %2183 = vmatprep.subr.mxu0 %v2801_v56  ;;  %v2828_v61 = vld [vmem:[%s3489_s2 + $0x1f0] sm:$0xff]  ;;  %v2852_v3 = vld [vmem:[%s3489_s2 + $0x1e8] sm:$0xff]  ;;  %v1066_v12 = vsel %vm1058_vm3, %v2789_v10, 0.0  ;;  %v1080_v15 = vsel %vm1058_vm3, %v2793_v54, 0.0  ;;  %v1059_v18 = vsel %vm1058_vm3, %v2787_v46, 0.0 }
 0x1a1   : > { %v2811_v58 = vld [vmem:[%s3489_s2 + $0x78] sm:$0xff]  ;;  %2218 = vmatprep.subr.mxu1 %v2806_v57  ;;  %v2835_v63 = vld [vmem:[%s3489_s2 + $0x70] sm:$0xff]  ;;  %v2857_v4 = vld [vmem:[%s3489_s2 + $0x68] sm:$0xff]  ;;  %v1073_v19 = vsel %vm1058_vm3, %v2791_v24, 0.0  ;;  %v1067_v22 = vrot.slane %v1066_v12, 4  ;;  %v1081_v26 = vrot.slane %v1080_v15, 4 }
 0x1a2   : > { %v2818_v59 = vld [vmem:[%s3489_s2 + $0x178] sm:$0xff]  ;;  %2184 = vmatpush3.msra.mxu0 %v2811_v58  ;;  %v2840_v0 = vld [vmem:[%s3489_s2 + $0x170] sm:$0xff]  ;;  %v2862_v5 = vld [vmem:[%s3489_s2 + $0x168] sm:$0xff]  ;;  %v1060_v30 = vrot.slane %v1059_v18, 4  ;;  %v1074_v31 = vrot.slane %v1073_v19, 4 }
 0x1a3   : > { %2219 = vmatpush3.msra.mxu1 %v2818_v59  ;;  %2185 = vmatprep.subr.mxu0 %v2823_v60  ;;  %v2869_v6 = vld [vmem:[%s3489_s2 + $0xe0] sm:$0xff]  ;;  %v2895_v13 = vld [vmem:[%s3489_s2 + $0xd8] sm:$0xff]  ;;  %v2925_v20 = vld [vmem:[%s3489_s2 + $0xd0] sm:$0xff]  ;;  %v1068_v36 = vadd.f32 %v1067_v22, %v1066_v12  ;;  %v1082_v8 = vadd.f32 %v1081_v26, %v1080_v15 }
 0x1a4   : > { %2220 = vmatprep.subr.mxu1 %v2828_v61  ;;  %2186 = vmatpush3.msra.mxu0 %v2835_v63  ;;  %v2874_v7 = vld [vmem:[%s3489_s2 + $0x1e0] sm:$0xff]  ;;  %v2900_v14 = vld [vmem:[%s3489_s2 + $0x1d8] sm:$0xff]  ;;  %v2930_v21 = vld [vmem:[%s3489_s2 + $0x1d0] sm:$0xff]  ;;  %v1061_v40 = vadd.f32 %v1060_v30, %v1059_v18  ;;  %v1075_v41 = vadd.f32 %v1074_v31, %v1073_v19 }
 0x1a5   : > { %2221 = vmatpush3.msra.mxu1 %v2840_v0  ;;  %2187 = vmatprep.subr.mxu0 %v2845_v2  ;;  %v2881_v9 = vld [vmem:[%s3489_s2 + $0x60] sm:$0xff]  ;;  %v2909_v16 = vld [vmem:[%s3489_s2 + $0x58] sm:$0xff]  ;;  %v2937_v23 = vld [vmem:[%s3489_s2 + $0x50] sm:$0xff]  ;;  %v1069_v48 = vrot.slane %v1068_v36, 2  ;;  %v1083_v1 = vrot.slane %v1082_v8, 2 }
 0x1a6   : > { %2222 = vmatprep.subr.mxu1 %v2852_v3  ;;  %v2886_v11 = vld [vmem:[%s3489_s2 + $0x160] sm:$0xff]  ;;  %2188 = vmatpush3.msra.mxu0 %v2857_v4  ;;  %v2914_v17 = vld [vmem:[%s3489_s2 + $0x158] sm:$0xff]  ;;  %v2942_v25 = vld [vmem:[%s3489_s2 + $0x150] sm:$0xff]  ;;  %v1062_v52 = vrot.slane %v1061_v40, 2  ;;  %v1076_v53 = vrot.slane %v1075_v41, 2 }
 0x1a7   : > { %2223 = vmatpush3.msra.mxu1 %v2862_v5  ;;  %2189 = vmatprep.subr.mxu0 %v2869_v6  ;;  %v2949_v28 = vld [vmem:[%s3489_s2 + $0xc8] sm:$0xff]  ;;  %v2973_v34 = vld [vmem:[%s3489_s2 + $0xc0] sm:$0xff]  ;;  %v2997_v62 = vld [vmem:[%s3489_s2 + $0xb8] sm:$0xff]  ;;  %v1070_v19 = vadd.f32 %v1069_v48, %v1068_v36  ;;  %v1084_v30 = vadd.f32 %v1083_v1, %v1082_v8 }
 0x1a8   : > { %2224 = vmatprep.subr.mxu1 %v2874_v7  ;;  %2190 = vmatpush3.msra.mxu0 %v2881_v9  ;;  %v2954_v29 = vld [vmem:[%s3489_s2 + $0x1c8] sm:$0xff]  ;;  %v2978_v35 = vld [vmem:[%s3489_s2 + $0x1c0] sm:$0xff]  ;;  %v3002_v39 = vld [vmem:[%s3489_s2 + $0x1b8] sm:$0xff]  ;;  %v1063_v48 = vadd.f32 %v1062_v52, %v1061_v40  ;;  %v1077_v42 = vadd.f32 %v1076_v53, %v1075_v41 }
 0x1a9   : > { %2225 = vmatpush3.msra.mxu1 %v2886_v11  ;;  %2191 = vmatprep.subr.mxu0 %v2895_v13  ;;  %v2961_v32 = vld [vmem:[%s3489_s2 + $0x48] sm:$0xff]  ;;  %v2985_v37 = vld [vmem:[%s3489_s2 + $0x40] sm:$0xff]  ;;  %v3009_v43 = vld [vmem:[%s3489_s2 + $0x38] sm:$0xff]  ;;  %v1071_v52 = vrot.slane %v1070_v19, 1 }
 0x1aa   : > { %2226 = vmatprep.subr.mxu1 %v2900_v14  ;;  %2192 = vmatpush3.msra.mxu0 %v2909_v16  ;;  %v2966_v33 = vld [vmem:[%s3489_s2 + $0x148] sm:$0xff]  ;;  %v2990_v38 = vld [vmem:[%s3489_s2 + $0x140] sm:$0xff]  ;;  %v3014_v44 = vld [vmem:[%s3489_s2 + $0x138] sm:$0xff] }
 0x1ab   : > { %2227 = vmatpush3.msra.mxu1 %v2914_v17  ;;  %2193 = vmatprep.subr.mxu0 %v2925_v20  ;;  %v3021_v45 = vld [vmem:[%s3489_s2 + $0xb0] sm:$0xff]  ;;  %v3045_v50 = vld [vmem:[%s3489_s2 + $0xa8] sm:$0xff]  ;;  %v3069_v15 = vld [vmem:[%s3489_s2 + $0xa0] sm:$0xff] }
 0x1ac   : > { %2228 = vmatprep.subr.mxu1 %v2930_v21  ;;  %2194 = vmatpush3.msra.mxu0 %v2937_v23  ;;  %v3026_v47 = vld [vmem:[%s3489_s2 + $0x1b0] sm:$0xff]  ;;  %v3050_v51 = vld [vmem:[%s3489_s2 + $0x1a8] sm:$0xff]  ;;  %3516 = vst [vmem:[#allocation16_spill] sm:$0xff] %v3069_v15  ;;  %v3074_v18 = vld [vmem:[%s3489_s2 + $0x1a0] sm:$0xff] }
 0x1ad   : > { %2229 = vmatpush3.msra.mxu1 %v2942_v25  ;;  %2195 = vmatprep.subr.mxu0 %v2949_v28  ;;  %v3033_v27 = vld [vmem:[%s3489_s2 + $0x30] sm:$0xff]  ;;  %v3057_v55 = vld [vmem:[%s3489_s2 + $0x28] sm:$0xff]  ;;  %3517 = vst [vmem:[#allocation17_spill] sm:$0xff] %v3074_v18  ;;  %v3081_v22 = vld [vmem:[%s3489_s2 + $0x20] sm:$0xff] }
 0x1ae   : > { %2230 = vmatprep.subr.mxu1 %v2954_v29  ;;  %2196 = vmatpush3.msra.mxu0 %v2961_v32  ;;  %v3038_v49 = vld [vmem:[%s3489_s2 + $0x130] sm:$0xff]  ;;  %3514 = vst [vmem:[#allocation14_spill] sm:$0xff] %v3057_v55  ;;  %v3062_v12 = vld [vmem:[%s3489_s2 + $0x128] sm:$0xff]  ;;  %3518 = vst [vmem:[#allocation18_spill] sm:$0xff] %v3081_v22 }
 0x1af   : > { %2231 = vmatpush3.msra.mxu1 %v2966_v33  ;;  %2197 = vmatprep.subr.mxu0 %v2973_v34  ;;  %3515 = vst [vmem:[#allocation15_spill] sm:$0xff] %v3062_v12  ;;  %v3086_v26 = vld [vmem:[%s3489_s2 + $0x120] sm:$0xff]  ;;  %v3093_v31 = vld [vmem:[%s3489_s2 + $0x98] sm:$0xff]  ;;  %v3117_v40 = vld [vmem:[%s3489_s2 + $0x90] sm:$0xff] }
 0x1b0   : > { %2232 = vmatprep.subr.mxu1 %v2978_v35  ;;  %2198 = vmatpush3.msra.mxu0 %v2985_v37  ;;  %3519 = vst [vmem:[#allocation19_spill] sm:$0xff] %v3086_v26  ;;  %3520 = vst [vmem:[#allocation20_spill] sm:$0xff] %v3093_v31  ;;  %v3098_v36 = vld [vmem:[%s3489_s2 + $0x198] sm:$0xff]  ;;  %v3122_v41 = vld [vmem:[%s3489_s2 + $0x190] sm:$0xff] }
 0x1b1   : > { %2233 = vmatpush3.msra.mxu1 %v2990_v38  ;;  %2199 = vmatprep.subr.mxu0 %v2997_v62  ;;  %3521 = vst [vmem:[#allocation21_spill] sm:$0xff] %v3098_v36  ;;  %v3105_v8 = vld [vmem:[%s3489_s2 + $0x18] sm:$0xff]  ;;  %3524 = vst [vmem:[#allocation24_spill] sm:$0xff] %v3117_v40  ;;  %v3129_v53 = vld [vmem:[%s3489_s2 + $0x10] sm:$0xff] }
 0x1b2   : > { %2234 = vmatprep.subr.mxu1 %v3002_v39  ;;  %2200 = vmatpush3.msra.mxu0 %v3009_v43  ;;  %3522 = vst [vmem:[#allocation22_spill] sm:$0xff] %v3105_v8  ;;  %v3110_v1 = vld [vmem:[%s3489_s2 + $0x118] sm:$0xff]  ;;  %3525 = vst [vmem:[#allocation25_spill] sm:$0xff] %v3122_v41 }
 0x1b3   : > { %2235 = vmatpush3.msra.mxu1 %v3014_v44  ;;  %2201 = vmatprep.subr.mxu0 %v3021_v45  ;;  %3523 = vst [vmem:[#allocation23_spill] sm:$0xff] %v3110_v1  ;;  %3526 = vst [vmem:[#allocation26_spill] sm:$0xff] %v3129_v53 }
 0x1b4   : > { %2236 = vmatprep.subr.mxu1 %v3026_v47  ;;  %2202 = vmatpush3.msra.mxu0 %v3033_v27 }
 0x1b5   : > { %2237 = vmatpush3.msra.mxu1 %v3038_v49  ;;  %2203 = vmatprep.subr.mxu0 %v3045_v50 }
 0x1b6   : > { %2238 = vmatprep.subr.mxu1 %v3050_v51  ;;  %2204 = vmatpush3.msra.mxu0 %v3057_v55  ;;  %v3184_v55 = vld [vmem:[%s3489_s2 + $0x100] sm:$0xff] }
 0x1b7   : > { %2239 = vmatpush3.msra.mxu1 %v3062_v12  ;;  %2205 = vmatprep.subr.mxu0 %v3069_v15  ;;  %v1078_v15 = vrot.slane %v1077_v42, 1  ;;  %v1072_v12 = vadd.f32 %v1071_v52, %v1070_v19 }
 0x1b8   : > { %2240 = vmatprep.subr.mxu1 %v3074_v18  ;;  %2206 = vmatpush3.msra.mxu0 %v3081_v22  ;;  %v1085_v22 = vrot.slane %v1084_v30, 1  ;;  %v1064_v18 = vrot.slane %v1063_v48, 1 }
 0x1b9   : > { %2241 = vmatpush3.msra.mxu1 %v3086_v26  ;;  %2207 = vmatprep.subr.mxu0 %v3093_v31  ;;  %v3134_v26 = vld [vmem:[%s3489_s2 + $0x110] sm:$0xff]  ;;  %v3141_v31 = vld [vmem:[%s3489_s2 + $0x88] sm:$0xff]  ;;  %v1079_v52 = vadd.f32 %v1078_v15, %v1077_v42  ;;  %v1090_v42 = vmul.f32 %v2793_v54, %v2793_v54 }
 0x1ba   : > { %2242 = vmatprep.subr.mxu1 %v3098_v36  ;;  %3527 = vst [vmem:[#allocation27_spill] sm:$0xff] %v3134_v26  ;;  %2208 = vmatpush3.msra.mxu0 %v3105_v8  ;;  %v3146_v36 = vld [vmem:[%s3489_s2 + $0x188] sm:$0xff]  ;;  %v1065_v19 = vadd.f32 %v1064_v18, %v1063_v48  ;;  %v1088_v18 = vmul.f32 %v2789_v10, %v2789_v10 }
 0x1bb   : > { %2243 = vmatpush3.msra.mxu1 %v3110_v1  ;;  %2209 = vmatprep.subr.mxu0 %v3117_v40  ;;  %v3153_v1 = vld [vmem:[%s3489_s2 + $0x8] sm:$0xff]  ;;  %v3165_v40 = vld [vmem:[%s3489_s2 + $0x80] sm:$0xff] }
 0x1bc   : > { %2244 = vmatprep.subr.mxu1 %v3122_v41  ;;  %v3158_v8 = vld [vmem:[%s3489_s2 + $0x108] sm:$0xff]  ;;  %2210 = vmatpush3.msra.mxu0 %v3129_v53  ;;  %v3170_v41 = vld [vmem:[%s3489_s2 + $0x180] sm:$0xff] }
 0x1bd   : > { %2245 = vmatpush3.msra.mxu1 %v3134_v26  ;;  %2211 = vmatprep.subr.mxu0 %v3141_v31  ;;  %v3177_v53 = vld [vmem:[%s3489_s2] sm:$0xff]  ;;  %v1086_v26 = vadd.f32 %v1085_v22, %v1084_v30  ;;  %v2617_v22 = vmov 0.0  }
 0x1be   : > { %2246 = vmatprep.subr.mxu1 %v3146_v36  ;;  %2212 = vmatpush3.msra.mxu0 %v3153_v1  ;;  %1472 = vst.msk [vmem:[%s3493_s6] sm:$0x3] %vm1471_vm4, %v2617_v22 }
 0x1bf   : > { %2247 = vmatpush3.msra.mxu1 %v3158_v8  ;;  %2213 = vmatprep.subr.mxu0 %v3165_v40 }
 0x1c0   : > { %2248 = vmatprep.subr.mxu1 %v3170_v41  ;;  %2214 = vmatpush3.msra.mxu0 %v3177_v53 }
 0x1c1   : > { %1247 = vmatprep.mubr.f32.mxu0 %v1072_v12  ;;  %2249 = vmatpush3.msra.mxu1 %v3184_v55  ;;  %v1087_v12 = vmul.f32 %v2787_v46, %v2787_v46 }
 0x1c2   : > { %1317 = vmatprep.mubr.f32.mxu1 %v1086_v26  ;;  %1248 = vmatmul.mubr.f32.vlgmr.msra.gmra.mxu0 %v1065_v19 }
 0x1c3   : > { %1318 = vmatmul.mubr.f32.vlgmr.msra.gmra.mxu1 %v1079_v52  ;;  %2253 = vmatprep.subr.mxu0 %v2801_v56  ;;  %v1089_v56 = vmul.f32 %v2791_v24, %v2791_v24 }
 0x1c4   : > { %2288 = vmatprep.subr.mxu1 %v2806_v57  ;;  %2254 = vmatpush3.msra.mxu0 %v2811_v58  ;;  %v1098_v57 = vsel %vm1058_vm3, %v1088_v18, 0.0  ;;  %v1112_v58 = vsel %vm1058_vm3, %v1090_v42, 0.0  ;;  %v1463_v42 = vld [vmem:[#allocation2] sm:$0x3] }
 0x1c5   : > { %2289 = vmatpush3.msra.mxu1 %v2818_v59  ;;  %2255 = vmatprep.subr.mxu0 %v2823_v60  ;;  %v1091_v59 = vsel %vm1058_vm3, %v1087_v12, 0.0  ;;  %v1105_v60 = vsel %vm1058_vm3, %v1089_v56, 0.0 }
 0x1c6   : > { %2290 = vmatprep.subr.mxu1 %v2828_v61  ;;  %2256 = vmatpush3.msra.mxu0 %v2835_v63  ;;  %v1099_v61 = vrot.slane %v1098_v57, 4  ;;  %v1113_v63 = vrot.slane %v1112_v58, 4 }
 0x1c7   : > { %2291 = vmatpush3.msra.mxu1 %v2840_v0  ;;  %2257 = vmatprep.subr.mxu0 %v2845_v2  ;;  %v1092_v0 = vrot.slane %v1091_v59, 4  ;;  %v1106_v2 = vrot.slane %v1105_v60, 4 }
 0x1c8   : > { %2292 = vmatprep.subr.mxu1 %v2852_v3  ;;  %2258 = vmatpush3.msra.mxu0 %v2857_v4  ;;  %v1100_v3 = vadd.f32 %v1099_v61, %v1098_v57  ;;  %v1114_v4 = vadd.f32 %v1113_v63, %v1112_v58 }
 0x1c9   : > { %2293 = vmatpush3.msra.mxu1 %v2862_v5  ;;  %2259 = vmatprep.subr.mxu0 %v2869_v6  ;;  %v1093_v5 = vadd.f32 %v1092_v0, %v1091_v59  ;;  %v1107_v6 = vadd.f32 %v1106_v2, %v1105_v60 }
 0x1ca   : > { %2294 = vmatprep.subr.mxu1 %v2874_v7  ;;  %2260 = vmatpush3.msra.mxu0 %v2881_v9  ;;  %v1101_v7 = vrot.slane %v1100_v3, 2  ;;  %v1115_v9 = vrot.slane %v1114_v4, 2 }
 0x1cb   : > { %2295 = vmatpush3.msra.mxu1 %v2886_v11  ;;  %2261 = vmatprep.subr.mxu0 %v2895_v13  ;;  %v1094_v11 = vrot.slane %v1093_v5, 2  ;;  %v1108_v13 = vrot.slane %v1107_v6, 2 }
 0x1cc   : > { %2296 = vmatprep.subr.mxu1 %v2900_v14  ;;  %2262 = vmatpush3.msra.mxu0 %v2909_v16  ;;  %v1102_v14 = vadd.f32 %v1101_v7, %v1100_v3  ;;  %v1116_v16 = vadd.f32 %v1115_v9, %v1114_v4 }
 0x1cd   : > { %2297 = vmatpush3.msra.mxu1 %v2914_v17  ;;  %2263 = vmatprep.subr.mxu0 %v2925_v20  ;;  %v3528_v17 = vld [vmem:[#allocation14_spill] sm:$0xff]  ;;  %v3529_v20 = vld [vmem:[#allocation15_spill] sm:$0xff] }
 0x1ce   : > { %2298 = vmatprep.subr.mxu1 %v2930_v21  ;;  %2264 = vmatpush3.msra.mxu0 %v2937_v23  ;;  %v1095_v21 = vadd.f32 %v1094_v11, %v1093_v5  ;;  %v1109_v23 = vadd.f32 %v1108_v13, %v1107_v6 }
 0x1cf   : > { %2299 = vmatpush3.msra.mxu1 %v2942_v25  ;;  %2265 = vmatprep.subr.mxu0 %v2949_v28  ;;  %v3530_v25 = vld [vmem:[#allocation16_spill] sm:$0xff]  ;;  %v3531_v28 = vld [vmem:[#allocation17_spill] sm:$0xff] }
 0x1d0   : > { %2300 = vmatprep.subr.mxu1 %v2954_v29  ;;  %2266 = vmatpush3.msra.mxu0 %v2961_v32  ;;  %v3532_v29 = vld [vmem:[#allocation18_spill] sm:$0xff]  ;;  %v3533_v32 = vld [vmem:[#allocation19_spill] sm:$0xff] }
 0x1d1   : > { %2301 = vmatpush3.msra.mxu1 %v2966_v33  ;;  %2267 = vmatprep.subr.mxu0 %v2973_v34  ;;  %v1103_v33 = vrot.slane %v1102_v14, 1  ;;  %v3534_v34 = vld [vmem:[#allocation20_spill] sm:$0xff] }
 0x1d2   : > { %2302 = vmatprep.subr.mxu1 %v2978_v35  ;;  %2268 = vmatpush3.msra.mxu0 %v2985_v37  ;;  %v3535_v35 = vld [vmem:[#allocation21_spill] sm:$0xff]  ;;  %v1117_v37 = vrot.slane %v1116_v16, 1 }
 0x1d3   : > { %2303 = vmatpush3.msra.mxu1 %v2990_v38  ;;  %2269 = vmatprep.subr.mxu0 %v2997_v62  ;;  %v3536_v38 = vld [vmem:[#allocation22_spill] sm:$0xff]  ;;  %v3537_v62 = vld [vmem:[#allocation23_spill] sm:$0xff] }
 0x1d4   : > { %2304 = vmatprep.subr.mxu1 %v3002_v39  ;;  %2270 = vmatpush3.msra.mxu0 %v3009_v43  ;;  %v1096_v39 = vrot.slane %v1095_v21, 1  ;;  %v1110_v43 = vrot.slane %v1109_v23, 1 }
 0x1d5   : > { %2305 = vmatpush3.msra.mxu1 %v3014_v44  ;;  %2271 = vmatprep.subr.mxu0 %v3021_v45  ;;  %v3538_v44 = vld [vmem:[#allocation24_spill] sm:$0xff]  ;;  %v3539_v45 = vld [vmem:[#allocation25_spill] sm:$0xff] }
 0x1d6   : > { %2306 = vmatprep.subr.mxu1 %v3026_v47  ;;  %2272 = vmatpush3.msra.mxu0 %v3033_v27  ;;  %v3540_v47 = vld [vmem:[#allocation26_spill] sm:$0xff]  ;;  %v3541_v27 = vld [vmem:[#allocation27_spill] sm:$0xff]  ;;  %v1111_v15 = vadd.f32 %v1110_v43, %v1109_v23 }
 0x1d7   : > { %2307 = vmatpush3.msra.mxu1 %v3038_v49  ;;  %2273 = vmatprep.subr.mxu0 %v3045_v50  ;;  %v1104_v49 = vadd.f32 %v1103_v33, %v1102_v14  ;;  %v1118_v50 = vadd.f32 %v1117_v37, %v1116_v16 }
 0x1d8   : > { %2308 = vmatprep.subr.mxu1 %v3050_v51  ;;  %2274 = vmatpush3.msra.mxu0 %v3528_v17  ;;  %v1097_v51 = vadd.f32 %v1096_v39, %v1095_v21 }
 0x1d9   : > { %2309 = vmatpush3.msra.mxu1 %v3529_v20  ;;  %2275 = vmatprep.subr.mxu0 %v3530_v25 }
 0x1da   : > { %2310 = vmatprep.subr.mxu1 %v3531_v28  ;;  %2276 = vmatpush3.msra.mxu0 %v3532_v29 }
 0x1db   : > { %2311 = vmatpush3.msra.mxu1 %v3533_v32  ;;  %2277 = vmatprep.subr.mxu0 %v3534_v34 }
 0x1dc   : > { %2312 = vmatprep.subr.mxu1 %v3535_v35  ;;  %2278 = vmatpush3.msra.mxu0 %v3536_v38 }
 0x1dd   : > { %2313 = vmatpush3.msra.mxu1 %v3537_v62  ;;  %2279 = vmatprep.subr.mxu0 %v3538_v44 }
 0x1de   : > { %2314 = vmatprep.subr.mxu1 %v3539_v45  ;;  %2280 = vmatpush3.msra.mxu0 %v3540_v47 }
 0x1df   : > { %2315 = vmatpush3.msra.mxu1 %v3541_v27  ;;  %2281 = vmatprep.subr.mxu0 %v3141_v31 }
 0x1e0   : > { %2316 = vmatprep.subr.mxu1 %v3146_v36  ;;  %2282 = vmatpush3.msra.mxu0 %v3153_v1 }
 0x1e1   : > { %2317 = vmatpush3.msra.mxu1 %v3158_v8  ;;  %2283 = vmatprep.subr.mxu0 %v3165_v40 }
 0x1e2   : > { %2318 = vmatprep.subr.mxu1 %v3170_v41  ;;  %2284 = vmatpush3.msra.mxu0 %v3177_v53 }
 0x1e3   : > { %1387 = vmatprep.mubr.f32.mxu0 %v1104_v49  ;;  %2319 = vmatpush3.msra.mxu1 %v3184_v55 }
 0x1e4   : > { %1457 = vmatprep.mubr.f32.mxu1 %v1118_v50  ;;  %1388 = vmatmul.mubr.f32.vlgmr.msra.gmra.mxu0 %v1097_v51 }
 0x1e5   : > { %1458 = vmatmul.mubr.f32.vlgmr.msra.gmra.mxu1 %v1111_v15 }
 0x282   : > { %v2215_v26 = vpop.f32.mrf.mxu0 }
 0x283   : > { %v2250_v30 = vpop.f32.mrf.mxu1 }
 0x284   : > { %v2216_v31 = vpop.f32.mrf.mxu0 }
 0x285   : > { %v2251_v36 = vpop.f32.mrf.mxu1  ;;  %v2217_v41 = vadd.f32 %v2216_v31, %v2215_v26 }
 0x286   : > { %v2252_v53 = vadd.f32 %v2251_v36, %v2250_v30 }
 0x288   : > { %v1320_v18 = vadd.f32 %v2252_v53, %v2217_v41 }
 0x2a4   : > { %v2285_v48 = vpop.f32.mrf.mxu0 }
 0x2a5   : > { %v2320_v8 = vpop.f32.mrf.mxu1 }
 0x2a6   : > { %v2286_v1 = vpop.f32.mrf.mxu0 }
 0x2a7   : > { %v2321_v40 = vpop.f32.mrf.mxu1  ;;  %v2287_v55 = vadd.f32 %v2286_v1, %v2285_v48 }
 0x2a8   : > { %v2322_v19 = vadd.f32 %v2321_v40, %v2320_v8 }
 0x2aa   : > { %v1460_v52 = vadd.f32 %v2322_v19, %v2287_v55 }
 0x2ac   : > { %v1465_v12 = vrot.slane %v1460_v52, 7 }
 0x2ae   : > { %v1467_v56 = vsel %vm608_vm0, %v1320_v18, %v1465_v12 }
 0x2af   : > { %v1468_v57 = vadd.f32 %v1467_v56, %v1463_v42 }
 0x2b1   : > { %1470 = vst.msk [vmem:[#allocation2] sm:$0x3] %vm1469_vm5, %v1468_v57 }
 0x2b2 PF: > { %p2173_p5 = scmp.ne.s32.totalorder %s2598_s21, 1 }
 0x2b4   : > { %1476 = sbr.rel (%p2173_p5) target bundleno = 1146 (0x47a), region = 72 }
 0x2b9   : > { %v1509_v58 = vld [vmem:[#allocation7 + $0x68] sm:$0xff]  ;;  %v1511_v59 = vld [vmem:[#allocation7 + $0x78] sm:$0xff]  ;;  %v1508_v60 = vld [vmem:[#allocation7 + $0x60] sm:$0xff]  ;;  %v2618_v20 = vmov 0.0   ;;  %vm1512_vm6 = vcmask 261120   ;;  %vm2061_vm7 = vcmask 1024  }
 0x2ba   : > { %1540 = vmatprep.subr.mxu0 %v1509_v58  ;;  %1611 = vmatprep.subr.mxu1 %v1511_v59  ;;  %v1510_v61 = vld [vmem:[#allocation7 + $0x70] sm:$0xff]  ;;  %v1505_v63 = vld [vmem:[#allocation7 + $0x48] sm:$0xff]  ;;  %v1507_v0 = vld [vmem:[#allocation7 + $0x58] sm:$0xff] }
 0x2bb   : > { %1541 = vmatpush1.msra.mxu0 %v1508_v60  ;;  %1612 = vmatpush1.msra.mxu1 %v1510_v61  ;;  %v1504_v2 = vld [vmem:[#allocation7 + $0x40] sm:$0xff]  ;;  %v1506_v3 = vld [vmem:[#allocation7 + $0x50] sm:$0xff]  ;;  %v1501_v4 = vld [vmem:[#allocation7 + $0x28] sm:$0xff] }
 0x2bc   : > { %1542 = vmatprep.subr.mxu0 %v1505_v63  ;;  %1613 = vmatprep.subr.mxu1 %v1507_v0  ;;  %v1503_v5 = vld [vmem:[#allocation7 + $0x38] sm:$0xff]  ;;  %v1500_v6 = vld [vmem:[#allocation7 + $0x20] sm:$0xff]  ;;  %v1502_v7 = vld [vmem:[#allocation7 + $0x30] sm:$0xff] }
 0x2bd   : > { %1543 = vmatpush1.msra.mxu0 %v1504_v2  ;;  %1614 = vmatpush1.msra.mxu1 %v1506_v3  ;;  %v1497_v9 = vld [vmem:[#allocation7 + $0x8] sm:$0xff]  ;;  %v1499_v11 = vld [vmem:[#allocation7 + $0x18] sm:$0xff]  ;;  %v1496_v13 = vld [vmem:[#allocation7] sm:$0xff] }
 0x2be   : > { %1544 = vmatprep.subr.mxu0 %v1501_v4  ;;  %1615 = vmatprep.subr.mxu1 %v1503_v5  ;;  %v1477_v14 = vld [vmem:[#allocation2] sm:$0x3]  ;;  %v1478_v32 = vld [vmem:[#allocation8] sm:$0x3]  ;;  %v1883_v39 = vld [vmem:[%s3492_s5 + $0xf8] sm:$0xff] }
 0x2bf   : > { %1545 = vmatpush1.msra.mxu0 %v1500_v6  ;;  %1616 = vmatpush1.msra.mxu1 %v1502_v7  ;;  %v1498_v16 = vld [vmem:[#allocation7 + $0x10] sm:$0xff]  ;;  %v1479_v17 = vmul.f32 0.03125, %v1477_v14  ;;  %v1882_v47 = vld [vmem:[%s3492_s5 + $0xf0] sm:$0xff]  ;;  %v1881_v51 = vld [vmem:[%s3492_s5 + $0xe8] sm:$0xff] }
 0x2c0   : > { %1546 = vmatprep.subr.mxu0 %v1497_v9  ;;  %1617 = vmatprep.subr.mxu1 %v1499_v11  ;;  %v1915_v43 = vld [vmem:[%s3492_s5 + $0x1f8] sm:$0xff]  ;;  %v1914_v27 = vld [vmem:[%s3492_s5 + $0x1f0] sm:$0xff]  ;;  %v1913_v15 = vld [vmem:[%s3492_s5 + $0x1e8] sm:$0xff] }
 0x2c1   : > { %1547 = vmatpush1.msra.mxu0 %v1496_v13  ;;  %1580 = vmatprep.mubr.f32.mxu0 %v2618_v20  ;;  %v1480_v21 = vmul.f32 %v1479_v17, %v1479_v17  ;;  %v1867_v44 = vld [vmem:[%s3492_s5 + $0x78] sm:$0xff]  ;;  %v1866_v49 = vld [vmem:[%s3492_s5 + $0x70] sm:$0xff]  ;;  %v1865_v22 = vld [vmem:[%s3492_s5 + $0x68] sm:$0xff] }
 0x2c2   : > { %1618 = vmatpush1.msra.mxu1 %v1498_v16  ;;  %1651 = vmatprep.mubr.f32.mxu1 %v2618_v20  ;;  %v1899_v45 = vld [vmem:[%s3492_s5 + $0x178] sm:$0xff]  ;;  %v1898_v50 = vld [vmem:[%s3492_s5 + $0x170] sm:$0xff]  ;;  %v1897_v26 = vld [vmem:[%s3492_s5 + $0x168] sm:$0xff] }
 0x2c3   : > { %v1482_v23 = vrot.slane %v1480_v21, 7  ;;  %1686 = vmatprep.subr.mxu0 %v1509_v58  ;;  %1757 = vmatprep.subr.mxu1 %v1511_v59  ;;  %v1880_v30 = vld [vmem:[%s3492_s5 + $0xe0] sm:$0xff]  ;;  %v1879_v8 = vld [vmem:[%s3492_s5 + $0xd8] sm:$0xff]  ;;  %v1878_v53 = vld [vmem:[%s3492_s5 + $0xd0] sm:$0xff] }
 0x2c4   : > { %v1912_v31 = vld [vmem:[%s3492_s5 + $0x1e0] sm:$0xff]  ;;  %v1911_v1 = vld [vmem:[%s3492_s5 + $0x1d8] sm:$0xff]  ;;  %v1910_v55 = vld [vmem:[%s3492_s5 + $0x1d0] sm:$0xff] }
 0x2c5   : > { %v1484_v25 = vsub.f32 %v1479_v17, %v1482_v23  ;;  %v1864_v36 = vld [vmem:[%s3492_s5 + $0x60] sm:$0xff]  ;;  %v1863_v40 = vld [vmem:[%s3492_s5 + $0x58] sm:$0xff]  ;;  %v1862_v19 = vld [vmem:[%s3492_s5 + $0x50] sm:$0xff] }
 0x2c6   : > { %v1896_v48 = vld [vmem:[%s3492_s5 + $0x160] sm:$0xff]  ;;  %v1895_v41 = vld [vmem:[%s3492_s5 + $0x158] sm:$0xff]  ;;  %v1894_v52 = vld [vmem:[%s3492_s5 + $0x150] sm:$0xff] }
 0x2c7   : > { %v1485_v28 = vadd.f32 1e-05, %v1484_v25  ;;  %v1877_v18 = vld [vmem:[%s3492_s5 + $0xc8] sm:$0xff]  ;;  %v1876_v57 = vld [vmem:[%s3492_s5 + $0xc0] sm:$0xff]  ;;  %v1871_v21 = vld [vmem:[%s3492_s5 + $0x98] sm:$0xff] }
 0x2c8   : > { %v1909_v42 = vld [vmem:[%s3492_s5 + $0x1c8] sm:$0xff]  ;;  %v1908_v58 = vld [vmem:[%s3492_s5 + $0x1c0] sm:$0xff]  ;;  %v1903_v23 = vld [vmem:[%s3492_s5 + $0x198] sm:$0xff] }
 0x2c9   : > { %2466 = vrsqrt.f32 %v1485_v28  ;;  %v1861_v12 = vld [vmem:[%s3492_s5 + $0x48] sm:$0xff]  ;;  %v1860_v59 = vld [vmem:[%s3492_s5 + $0x40] sm:$0xff]  ;;  %v1855_v25 = vld [vmem:[%s3492_s5 + $0x18] sm:$0xff] }
 0x2ca   : > { %v1893_v56 = vld [vmem:[%s3492_s5 + $0x148] sm:$0xff]  ;;  %v1872_v14 = vld [vmem:[%s3492_s5 + $0xa0] sm:$0xff]  ;;  %v1887_v28 = vld [vmem:[%s3492_s5 + $0x118] sm:$0xff] }
 0x2d6   : > { %v2467_v29 = vpop.eup %2466 }
 0x2d7   : > { %v1488_v33 = vrot.slane %v2467_v29, 1  ;;  %v1870_v29 = vld [vmem:[%s3492_s5 + $0x90] sm:$0xff] }
 0x2d9   : > { %v1490_v34 = vmul.f32 %v1488_v33, %v1478_v32  ;;  %v1854_v33 = vld [vmem:[%s3492_s5 + $0x10] sm:$0xff] }
 0x2db   : > { %v1491_v35 = vmul.f32 %v1490_v34, %v1479_v17  ;;  %2174 = vmatmul.mubr.msk.f32.vlgmr.msra.gmra.mxu0 %vm1512_vm6, %v1490_v34  ;;  %2175 = vmatmul.mubr.msk.f32.vlgmr.msra.gmra.mxu1 %vm1512_vm6, %v1490_v34  ;;  %v1856_v17 = vld [vmem:[%s3492_s5 + $0x20] sm:$0xff]  ;;  %v1886_v34 = vld [vmem:[%s3492_s5 + $0x110] sm:$0xff] }
 0x2dc   : > { %1687 = vmatpush1.msra.mxu0 %v1508_v60  ;;  %1758 = vmatpush1.msra.mxu1 %v1510_v61  ;;  %v1892_v60 = vld [vmem:[%s3492_s5 + $0x140] sm:$0xff]  ;;  %v1875_v61 = vld [vmem:[%s3492_s5 + $0xb8] sm:$0xff] }
 0x2dd   : > { %v1493_v37 = vrot.slane %v1491_v35, 7  ;;  %1688 = vmatprep.subr.mxu0 %v1505_v63  ;;  %1759 = vmatprep.subr.mxu1 %v1507_v0  ;;  %v1907_v63 = vld [vmem:[%s3492_s5 + $0x1b8] sm:$0xff]  ;;  %v1869_v35 = vld [vmem:[%s3492_s5 + $0x88] sm:$0xff] }
 0x2de   : > { %1689 = vmatpush1.msra.mxu0 %v1504_v2  ;;  %1760 = vmatpush1.msra.mxu1 %v1506_v3  ;;  %v1859_v0 = vld [vmem:[%s3492_s5 + $0x38] sm:$0xff]  ;;  %v1874_v3 = vld [vmem:[%s3492_s5 + $0xb0] sm:$0xff] }
 0x2df   : > { %v1495_v38 = vsub.f32 %v1478_v32, %v1493_v37  ;;  %1690 = vmatprep.subr.mxu0 %v1501_v4  ;;  %1761 = vmatprep.subr.mxu1 %v1503_v5  ;;  %v1891_v2 = vld [vmem:[%s3492_s5 + $0x138] sm:$0xff]  ;;  %v1906_v4 = vld [vmem:[%s3492_s5 + $0x1b0] sm:$0xff]  ;;  %v1901_v37 = vld [vmem:[%s3492_s5 + $0x188] sm:$0xff] }
 0x2e0   : > { %1691 = vmatpush1.msra.mxu0 %v1500_v6  ;;  %1762 = vmatpush1.msra.mxu1 %v1502_v7  ;;  %v1858_v5 = vld [vmem:[%s3492_s5 + $0x30] sm:$0xff]  ;;  %v1873_v7 = vld [vmem:[%s3492_s5 + $0xa8] sm:$0xff] }
 0x2e1   : > { %v1659_v62 = vrot.slane %v1495_v38, 1  ;;  %1692 = vmatprep.subr.mxu0 %v1497_v9  ;;  %1763 = vmatprep.subr.mxu1 %v1499_v11  ;;  %v1890_v6 = vld [vmem:[%s3492_s5 + $0x130] sm:$0xff]  ;;  %v1905_v9 = vld [vmem:[%s3492_s5 + $0x1a8] sm:$0xff] }
 0x2e2   : > { %1693 = vmatpush1.msra.mxu0 %v1496_v13  ;;  %1726 = vmatprep.mubr.f32.mxu0 %v2618_v20  ;;  %v1857_v11 = vld [vmem:[%s3492_s5 + $0x28] sm:$0xff]  ;;  %v1902_v32 = vld [vmem:[%s3492_s5 + $0x190] sm:$0xff] }
 0x2e3   : > { %1764 = vmatpush1.msra.mxu1 %v1498_v16  ;;  %1797 = vmatprep.mubr.f32.mxu1 %v2618_v20  ;;  %v1889_v13 = vld [vmem:[%s3492_s5 + $0x128] sm:$0xff]  ;;  %v1904_v16 = vld [vmem:[%s3492_s5 + $0x1a0] sm:$0xff] }
 0x2e4   : > { %2176 = vmatmul.mubr.msk.f32.vlgmr.msra.gmra.mxu0 %vm1512_vm6, %v1659_v62  ;;  %2177 = vmatmul.mubr.msk.f32.vlgmr.msra.gmra.mxu1 %vm1512_vm6, %v1659_v62  ;;  %v1888_v20 = vld [vmem:[%s3492_s5 + $0x120] sm:$0xff]  ;;  %v1853_v38 = vld [vmem:[%s3492_s5 + $0x8] sm:$0xff] }
 0x2e5   : > { %2323 = vmatprep.subr.mxu0 %v1883_v39  ;;  %2358 = vmatprep.subr.mxu1 %v1915_v43  ;;  %v1885_v62 = vld [vmem:[%s3492_s5 + $0x108] sm:$0xff]  ;;  %v1868_v39 = vld [vmem:[%s3492_s5 + $0x80] sm:$0xff] }
 0x2e6   : > { %2324 = vmatpush3.msra.mxu0 %v1867_v44  ;;  %2359 = vmatpush3.msra.mxu1 %v1899_v45  ;;  %v1900_v43 = vld [vmem:[%s3492_s5 + $0x180] sm:$0xff] }
 0x2e7   : > { %2325 = vmatprep.subr.mxu0 %v1882_v47  ;;  %2360 = vmatprep.subr.mxu1 %v1914_v27  ;;  %v1852_v44 = vld [vmem:[%s3492_s5] sm:$0xff] }
 0x2e8   : > { %2326 = vmatpush3.msra.mxu0 %v1866_v49  ;;  %2361 = vmatpush3.msra.mxu1 %v1898_v50  ;;  %v1884_v45 = vld [vmem:[%s3492_s5 + $0x100] sm:$0xff]  ;;  %v3542_v49 = vld [vmem:[#allocation13_spill] sm:$0xff] }
 0x2e9   : > { %2327 = vmatprep.subr.mxu0 %v1881_v51  ;;  %2362 = vmatprep.subr.mxu1 %v1913_v15  ;;  %v1806_v50 = vsub.s32 0, %v3542_v49 }
 0x2ea   : > { %2328 = vmatpush3.msra.mxu0 %v1865_v22  ;;  %2363 = vmatpush3.msra.mxu1 %v1897_v26 }
 0x2eb   : > { %2329 = vmatprep.subr.mxu0 %v1880_v30  ;;  %2364 = vmatprep.subr.mxu1 %v1912_v31 }
 0x2ec   : > { %2330 = vmatpush3.msra.mxu0 %v1864_v36  ;;  %2365 = vmatpush3.msra.mxu1 %v1896_v48 }
 0x2ed   : > { %2331 = vmatprep.subr.mxu0 %v1879_v8  ;;  %2366 = vmatprep.subr.mxu1 %v1911_v1 }
 0x2ee   : > { %2332 = vmatpush3.msra.mxu0 %v1863_v40  ;;  %2367 = vmatpush3.msra.mxu1 %v1895_v41 }
 0x2ef   : > { %2333 = vmatprep.subr.mxu0 %v1878_v53  ;;  %2368 = vmatprep.subr.mxu1 %v1910_v55 }
 0x2f0   : > { %2334 = vmatpush3.msra.mxu0 %v1862_v19  ;;  %2369 = vmatpush3.msra.mxu1 %v1894_v52 }
 0x2f1   : > { %2335 = vmatprep.subr.mxu0 %v1877_v18  ;;  %2370 = vmatprep.subr.mxu1 %v1909_v42 }
 0x2f2   : > { %2336 = vmatpush3.msra.mxu0 %v1861_v12  ;;  %2371 = vmatpush3.msra.mxu1 %v1893_v56 }
 0x2f3   : > { %2337 = vmatprep.subr.mxu0 %v1876_v57  ;;  %2372 = vmatprep.subr.mxu1 %v1908_v58 }
 0x2f4   : > { %2338 = vmatpush3.msra.mxu0 %v1860_v59  ;;  %2373 = vmatpush3.msra.mxu1 %v1892_v60 }
 0x2f5   : > { %2339 = vmatprep.subr.mxu0 %v1875_v61  ;;  %2374 = vmatprep.subr.mxu1 %v1907_v63 }
 0x2f6   : > { %2340 = vmatpush3.msra.mxu0 %v1859_v0  ;;  %2375 = vmatpush3.msra.mxu1 %v1891_v2 }
 0x2f7   : > { %2341 = vmatprep.subr.mxu0 %v1874_v3  ;;  %2376 = vmatprep.subr.mxu1 %v1906_v4  ;;  %v2178_v3 = vld [vmem:[%s3492_s5 + $0x200] ss:$0 sm:$0xff] }
 0x2f8   : > { %2342 = vmatpush3.msra.mxu0 %v1858_v5  ;;  %2377 = vmatpush3.msra.mxu1 %v1890_v6 }
 0x2f9   : > { %2343 = vmatprep.subr.mxu0 %v1873_v7  ;;  %2378 = vmatprep.subr.mxu1 %v1905_v9 }
 0x2fa   : > { %2344 = vmatpush3.msra.mxu0 %v1857_v11  ;;  %2379 = vmatpush3.msra.mxu1 %v1889_v13 }
 0x2fb   : > { %2345 = vmatprep.subr.mxu0 %v1872_v14  ;;  %2380 = vmatprep.subr.mxu1 %v1904_v16 }
 0x2fc   : > { %2346 = vmatpush3.msra.mxu0 %v1856_v17  ;;  %2381 = vmatpush3.msra.mxu1 %v1888_v20 }
 0x2fd   : > { %2347 = vmatprep.subr.mxu0 %v1871_v21  ;;  %2382 = vmatprep.subr.mxu1 %v1903_v23 }
 0x2fe   : > { %2348 = vmatpush3.msra.mxu0 %v1855_v25  ;;  %2383 = vmatpush3.msra.mxu1 %v1887_v28 }
 0x2ff   : > { %2349 = vmatprep.subr.mxu0 %v1870_v29  ;;  %2384 = vmatprep.subr.mxu1 %v1902_v32 }
 0x300   : > { %2350 = vmatpush3.msra.mxu0 %v1854_v33  ;;  %2385 = vmatpush3.msra.mxu1 %v1886_v34 }
 0x301   : > { %2351 = vmatprep.subr.mxu0 %v1869_v35  ;;  %2386 = vmatprep.subr.mxu1 %v1901_v37 }
 0x302   : > { %2352 = vmatpush3.msra.mxu0 %v1853_v38  ;;  %2387 = vmatpush3.msra.mxu1 %v1885_v62 }
 0x303   : > { %2353 = vmatprep.subr.mxu0 %v1868_v39  ;;  %2388 = vmatprep.subr.mxu1 %v1900_v43 }
 0x304   : > { %2354 = vmatpush3.msra.mxu0 %v1852_v44  ;;  %2389 = vmatpush3.msra.mxu1 %v1884_v45 }
 0x39b   : > { %v1582_v47 = vpop.f32.mrf.mxu0  ;;  %v1653_v27 = vpop.f32.mrf.mxu1 }
 0x39c   : > { %v1807_v22 = vrot.slane %v1582_v47, %v1806_v50  ;;  %v1815_v26 = vrot.slane %v1653_v27, %v1806_v50 }
 0x39d   : > { %v1584_v51 = vpop.f32.mrf.mxu0  ;;  %v1655_v15 = vpop.f32.mrf.mxu1 }
 0x39e   : > { %v1811_v30 = vrot.slane %v1584_v51, %v1806_v50  ;;  %v1819_v31 = vrot.slane %v1655_v15, %v1806_v50  ;;  %v1820_v8 = vmul.f32 %v1807_v22, %v2787_v46  ;;  %v1822_v1 = vmul.f32 %v1815_v26, %v2791_v24 }
 0x3a0   : > { %v1821_v53 = vmul.f32 %v1811_v30, %v2789_v10  ;;  %v1823_v55 = vmul.f32 %v1819_v31, %v2793_v54 }
 0x3a4   : > { %v1728_v36 = vpop.f32.mrf.mxu0  ;;  %v1799_v48 = vpop.f32.mrf.mxu1 }
 0x3a5   : > { %v1827_v40 = vrot.slane %v1728_v36, %v1806_v50  ;;  %v1835_v41 = vrot.slane %v1799_v48, %v1806_v50 }
 0x3a6   : > { %v1730_v19 = vpop.f32.mrf.mxu0  ;;  %v1801_v52 = vpop.f32.mrf.mxu1 }
 0x3a7   : > { %v1840_v18 = vadd.f32 %v1827_v40, %v1820_v8  ;;  %v1842_v42 = vadd.f32 %v1835_v41, %v1822_v1  ;;  %v1831_v12 = vrot.slane %v1730_v19, %v1806_v50  ;;  %v1839_v56 = vrot.slane %v1801_v52, %v1806_v50 }
 0x3a9   : > { %v1841_v57 = vadd.f32 %v1831_v12, %v1821_v53  ;;  %v1843_v58 = vadd.f32 %v1839_v56, %v1823_v55  ;;  %v1844_v59 = vmul.f32 0.2, %v1840_v18  ;;  %v1846_v60 = vmul.f32 0.2, %v1842_v42 }
 0x3ab   : > { %v1845_v61 = vmul.f32 0.2, %v1841_v57  ;;  %v1847_v46 = vmul.f32 0.2, %v1843_v58  ;;  %v1848_v0 = vmax.f32 %v1840_v18, %v1844_v59  ;;  %v1850_v2 = vmax.f32 %v1842_v42, %v1846_v60 }
 0x3ad   : > { %v1849_v63 = vmax.f32 %v1841_v57, %v1845_v61  ;;  %v1851_v24 = vmax.f32 %v1843_v58, %v1847_v46 }
 0x3af   : > { %1985 = vmatprep.mubr.f32.mxu0 %v1849_v63  ;;  %2055 = vmatprep.mubr.f32.mxu1 %v1851_v24 }
 0x3b0   : > { %1986 = vmatmul.mubr.f32.vlgmr.msra.gmra.mxu0 %v1848_v0  ;;  %2056 = vmatmul.mubr.f32.vlgmr.msra.gmra.mxu1 %v1850_v2 }
 0x470   : > { %v2355_v10 = vpop.f32.mrf.mxu0  ;;  %v2390_v54 = vpop.f32.mrf.mxu1 }
 0x472   : > { %v2356_v4 = vpop.f32.mrf.mxu0  ;;  %v2391_v5 = vpop.f32.mrf.mxu1 }
 0x473   : > { %v2357_v6 = vadd.f32 %v2356_v4, %v2355_v10  ;;  %v2392_v9 = vadd.f32 %v2391_v5, %v2390_v54 }
 0x475   : > { %v1988_v7 = vadd.f32 %v2357_v6, %v2178_v3 }
 0x477   : > { %v2058_v11 = vadd.f32 %v2392_v9, %v1988_v7 }
 0x479   : > { %2062 = vst.msk [vmem:[%s3493_s6] sm:$0x3] %vm2061_vm7, %v2058_v11 }
 0x47a PF: > { %s19_s23 = sadd.s32 1, %s2606_s23   ;;  %s3543_s21 = smov %s2602_s22 }
 0x47b   : > { %p16_p7 = scmp.ge.s32.totalorder %s19_s23, 4   ;;  %s3544_s22 = smov %s3546_s30 }
 0x47d   :  { %18 = sbr.rel (!%p16_p7) target bundleno = 4 (0x4), region = 101 }
 0x482   :  { %2082 = vsyncpa [#allocation4], 1 }
 0x483   :  { %2084 = vsyncpa [#allocation4 + $0x1], 1 }
 0x484   :  { %2085 = vsyncpa [#allocation6], 1 }
 0x485   :  { %2086 = vsyncpa [#allocation9], 1 }

</bundles_post_ra>
